<compile_context>
chip_gen: v7x
topology: tpu7x:2x2x1
jax: 0.10.0
libtpu: 0.0.40
codegen_flags: <defaults>
</compile_context>

<pallas_src>
import functools
import math

import jax
import jax.numpy as jnp
from jax.experimental import pallas as pl
from jax.experimental.pallas import tpu as pltpu


def _round_up(x, m):
    return (x + m - 1) // m * m


def make_layout(in_s, in_a, fc1, fc2):
    """Row offsets of each parameter inside the packed (rows, width) slab.

    Every section starts on an 8-row (sublane) boundary so the in-kernel static
    slices never straddle a sublane tile in an awkward way.
    """
    r_w1s = 0
    r_w1a = r_w1s + _round_up(in_s, 8)
    r_b1 = r_w1a + _round_up(in_a, 8)
    r_w2 = r_b1 + 8
    r_b2 = r_w2 + _round_up(fc1, 8)
    r_wq = r_b2 + 8
    r_bq = r_wq + 8
    rows = r_bq + 8
    width = _round_up(max(fc1, fc2, 1), 128)          # lane-dense slab rows
    dims = (in_s, in_a, fc1, fc2, r_w1s, r_w1a, r_b1, r_w2, r_b2, r_wq, r_bq)
    return dims, rows, width


def pack_critic_params(w1, b1, w2, b2, wq, bq, *, input_dims):
    """Pack all critic parameters into one (rows, width) f32 slab.

    Layouts expected:
      w1: (input_dims + n_agents*n_actions, fc1)   [in, out]  (transposed vs torch)
      b1: (fc1,)      w2: (fc1, fc2) [in, out]     b2: (fc2,)
      wq: (1, fc2)    (torch (out, in) layout)     bq: (1,)
    Returns (slab, dims) where dims is the static layout tuple for the kernel.
    """
    in_sa, fc1 = w1.shape
    in_s = input_dims
    in_a = in_sa - in_s
    fc2 = w2.shape[1]
    dims, rows, width = make_layout(in_s, in_a, fc1, fc2)
    (_, _, _, _, r_w1s, r_w1a, r_b1, r_w2, r_b2, r_wq, r_bq) = dims

    slab = jnp.zeros((rows, width), jnp.float32)
    slab = slab.at[r_w1s:r_w1s + in_s, :fc1].set(w1[:in_s])
    slab = slab.at[r_w1a:r_w1a + in_a, :fc1].set(w1[in_s:])
    slab = slab.at[r_b1, :fc1].set(jnp.reshape(b1, (fc1,)))
    slab = slab.at[r_w2:r_w2 + fc1, :fc2].set(w2)
    slab = slab.at[r_b2, :fc2].set(jnp.reshape(b2, (fc2,)))
    slab = slab.at[r_wq, :fc2].set(jnp.reshape(wq, (fc2,)))
    slab = slab.at[r_bq, 0].set(jnp.reshape(bq, (-1,))[0])
    return slab, dims


def _critic_kernel(s_ref, a_ref, p_ref, o_ref, *, dims):
    (in_s, in_a, fc1, fc2,
     r_w1s, r_w1a, r_b1, r_w2, r_b2, r_wq, r_bq) = dims

    # Static views into the packed parameter slab (one DMA'd operand).
    w1s = p_ref[r_w1s:r_w1s + in_s, :fc1]
    w1a = p_ref[r_w1a:r_w1a + in_a, :fc1]
    b1 = p_ref[r_b1:r_b1 + 1, :fc1]
    w2 = p_ref[r_w2:r_w2 + fc1, :fc2]
    b2 = p_ref[r_b2:r_b2 + 1, :fc2]
    wq = p_ref[r_wq:r_wq + 1, :fc2]
    bq = p_ref[r_bq:r_bq + 1, :1]

    # Layer 1: cat([state, action]) @ W1 + b1, as two MXU pushes into f32.
    h1 = (jnp.dot(s_ref[...], w1s, preferred_element_type=jnp.float32)
          + jnp.dot(a_ref[...], w1a, preferred_element_type=jnp.float32)
          + b1)
    h1 = jnp.maximum(h1, 0.0)

    # Layer 2.
    h2 = jnp.dot(h1, w2, preferred_element_type=jnp.float32) + b2
    h2 = jnp.maximum(h2, 0.0)

    # Q layer: row-weight multiply + lane reduction -> (tile_b, 1) column.
    q = jnp.sum(h2 * wq, axis=1, keepdims=True) + bq
    o_ref[...] = q.astype(o_ref.dtype)


def _critic_apply(state, action, slabs, dims, max_single_tile, block_b, dtype):
    n_nets, rows, width = slabs.shape
    batch, in_s = state.shape
    in_a = action.shape[1]
    fc1, fc2 = dims[2], dims[3]

    state = state.astype(dtype)
    action = action.astype(dtype)
    slabs = slabs.astype(dtype)

    # Tiling policy (review): one grid step for typical batches (the problem is
    # launch/overhead bound); only tile for large batches, with 128-multiple
    # tiles so a multi-tile "parallel" grid can use both v7x TensorCores.
    pad8 = _round_up(max(batch, 1), 8)
    if pad8 <= max_single_tile:
        tile_b = pad8
    else:
        tile_b = _round_up(min(block_b, pad8), 128)
    pad_b = _round_up(batch, tile_b)
    num_tiles = pad_b // tile_b
    if pad_b != batch:
        state = jnp.pad(state, ((0, pad_b - batch), (0, 0)))
        action = jnp.pad(action, ((0, pad_b - batch), (0, 0)))

    itemsize = jnp.dtype(dtype).itemsize
    flops = 2 * n_nets * pad_b * (in_s * fc1 + in_a * fc1 + fc1 * fc2 + fc2)
    bytes_accessed = (itemsize * (pad_b * (in_s + in_a) + n_nets * rows * width)
                      + 4 * n_nets * pad_b)

    kernel = functools.partial(_critic_kernel, dims=dims)

    q = pl.pallas_call(
        kernel,
        out_shape=jax.ShapeDtypeStruct((n_nets, pad_b, 1), jnp.float32),
        grid=(num_tiles, n_nets),
        in_specs=[
            # Batch-scaled inputs: tiled over the batch axis, shared across nets.
            pl.BlockSpec((tile_b, in_s), lambda i, n: (i, 0)),
            pl.BlockSpec((tile_b, in_a), lambda i, n: (i, 0)),
            # Packed parameter slab: one operand per net, constant across tiles.
            pl.BlockSpec((None, rows, width), lambda i, n: (n, 0, 0)),
        ],
        out_specs=pl.BlockSpec((None, tile_b, 1), lambda i, n: (n, i, 0)),
        compiler_params=pltpu.CompilerParams(
            dimension_semantics=("parallel", "parallel")),
        cost_estimate=pl.CostEstimate(
            flops=flops, transcendentals=0, bytes_accessed=bytes_accessed),
    )(state, action, slabs)

    return q[:, :batch, :]


@functools.partial(jax.jit,
                   static_argnames=("dims", "max_single_tile", "block_b", "dtype"))
def critic_forward(state, action, slab, *, dims, max_single_tile=4096,
                   block_b=2048, dtype=jnp.float32):
    """Single critic: q(state, action) with shape (batch, 1)."""
    q = _critic_apply(state, action, slab[None], dims, max_single_tile, block_b,
                      dtype)
    return q[0]


@functools.partial(jax.jit,
                   static_argnames=("dims", "max_single_tile", "block_b", "dtype"))
def critic_forward_multi(state, action, slabs, *, dims, max_single_tile=4096,
                         block_b=2048, dtype=jnp.float32):
    """N critics (per-agent / target nets) fused into ONE pallas_call.

    slabs: (n_nets, rows, width); returns (n_nets, batch, 1).  All nets share the
    same joint (state, action) input, as in MADDPG.
    """
    return _critic_apply(state, action, slabs, dims, max_single_tile, block_b,
                         dtype)


def init_critic_params(key, input_dims, n_agents, n_actions, fc1_dims, fc2_dims):
    """torch.nn.Linear default init U(-1/sqrt(fan_in), +1/sqrt(fan_in)).

    Hidden weights are stored [in, out] (transposed vs torch); wq keeps the torch
    (1, fc2) layout.
    """
    in_sa = input_dims + n_agents * n_actions
    k1w, k1b, k2w, k2b, kqw, kqb = jax.random.split(key, 6)

    b1nd = 1.0 / math.sqrt(in_sa)
    w1 = jax.random.uniform(k1w, (in_sa, fc1_dims), jnp.float32, -b1nd, b1nd)
    b1 = jax.random.uniform(k1b, (fc1_dims,), jnp.float32, -b1nd, b1nd)

    b2nd = 1.0 / math.sqrt(fc1_dims)
    w2 = jax.random.uniform(k2w, (fc1_dims, fc2_dims), jnp.float32, -b2nd, b2nd)
    b2 = jax.random.uniform(k2b, (fc2_dims,), jnp.float32, -b2nd, b2nd)

    bqnd = 1.0 / math.sqrt(fc2_dims)
    wq = jax.random.uniform(kqw, (1, fc2_dims), jnp.float32, -bqnd, bqnd)
    bq = jax.random.uniform(kqb, (1,), jnp.float32, -bqnd, bqnd)
    return w1, b1, w2, b2, wq, bq


def _reference(state, action, w1, b1, w2, b2, wq, bq):
    x = jnp.concatenate([state, action], axis=1)
    h1 = jnp.maximum(x @ w1 + b1, 0.0)
    h2 = jnp.maximum(h1 @ w2 + b2, 0.0)
    return h2 @ wq.T + bq


# TODO(synk): optimizer (Adam) and checkpoint save/load from the PyTorch module are
# host-side training utilities, not part of the forward pass, and are not kernels.

if __name__ == "__main__":
    input_dims = 16
    n_agents = 2
    n_actions = 4
    fc1_dims = 64
    fc2_dims = 32

    key = jax.random.PRNGKey(0)
    k_s, k_a, k_p0, k_p1, k_p2, k_s2, k_a2 = jax.random.split(key, 7)

    raw0 = init_critic_params(k_p0, input_dims, n_agents, n_actions,
                              fc1_dims, fc2_dims)
    slab0, dims = pack_critic_params(*raw0, input_dims=input_dims)

    # Case 1: single critic; batch collapses to ONE grid step.
    batch = 512
    state = jax.random.normal(k_s, (batch, input_dims), jnp.float32)
    action = jax.random.normal(k_a, (batch, n_agents * n_actions), jnp.float32)
    q = critic_forward(state, action, slab0, dims=dims)
    jax.block_until_ready(q)
    ref = _reference(state, action, *raw0)
    assert q.shape == (batch, 1)
    assert jnp.allclose(q, ref, atol=1e-4, rtol=1e-4)

    # Case 2: ragged batch (pad to 8, slice back), still one grid step.
    batch2 = 200
    state2 = jax.random.normal(k_s2, (batch2, input_dims), jnp.float32)
    action2 = jax.random.normal(k_a2, (batch2, n_agents * n_actions), jnp.float32)
    q2 = critic_forward(state2, action2, slab0, dims=dims)
    jax.block_until_ready(q2)
    ref2 = _reference(state2, action2, *raw0)
    assert q2.shape == (batch2, 1)
    assert jnp.allclose(q2, ref2, atol=1e-4, rtol=1e-4)

    # Case 3: three critic networks fused into a single pallas_call (biggest win:
    # one launch + one input DMA amortized over all nets).
    raw1 = init_critic_params(k_p1, input_dims, n_agents, n_actions,
                              fc1_dims, fc2_dims)
    raw2 = init_critic_params(k_p2, input_dims, n_agents, n_actions,
                              fc1_dims, fc2_dims)
    slab1, _ = pack_critic_params(*raw1, input_dims=input_dims)
    slab2, _ = pack_critic_params(*raw2, input_dims=input_dims)
    slabs = jnp.stack([slab0, slab1, slab2])
    qm = critic_forward_multi(state, action, slabs, dims=dims)
    jax.block_until_ready(qm)
    assert qm.shape == (3, batch, 1)
    for idx, raw in enumerate((raw0, raw1, raw2)):
        assert jnp.allclose(qm[idx], _reference(state, action, *raw),
                            atol=1e-4, rtol=1e-4)

    # Case 4: force the multi-tile grid path (128-row tiles) to exercise tiling.
    q4 = critic_forward(state, action, slab0, dims=dims,
                        max_single_tile=128, block_b=128)
    jax.block_until_ready(q4)
    assert jnp.allclose(q4, ref, atol=1e-4, rtol=1e-4)

    # Case 5: bf16 inputs/weights (v6e/v7x HBM-traffic halving), f32 accumulation.
    qb = critic_forward(state, action, slab0, dims=dims, dtype=jnp.bfloat16)
    jax.block_until_ready(qb)
    assert float(jnp.mean(jnp.abs(qb - ref))) < 2e-2

    print("KERNEL_OK")
</pallas_src>

<mosaic_0001>
module attributes {stable_mosaic.version = 11 : i64} {
  func.func @_critic_kernel(%arg0: i32, %arg1: i32, %arg2: memref<512x16xf32, #tpu.memory_space<vmem>>, %arg3: memref<512x8xf32, #tpu.memory_space<vmem>>, %arg4: memref<1x120x128xf32, #tpu.memory_space<vmem>>, %arg5: memref<1x512x1xf32, #tpu.memory_space<vmem>>) attributes {dimension_semantics = [#tpu.dimension_semantics<parallel>, #tpu.dimension_semantics<parallel>], iteration_bounds = array<i64: 1, 1>, scalar_prefetch = 0 : i64, scratch_operands = 0 : i64, tpu.core_type = #tpu.core_type<tc>, window_params = [{transform_indices = @transform_0, window_bounds = array<i64: 512, 16>}, {transform_indices = @transform_1, window_bounds = array<i64: 512, 8>}, {transform_indices = @transform_2, window_bounds = array<i64: 1, 120, 128>}, {transform_indices = @transform_3, window_bounds = array<i64: 1, 512, 1>}]} {
    %c0 = arith.constant 0 : index
    %c0_0 = arith.constant 0 : index
    %c0_1 = arith.constant 0 : index
    %0 = vector.load %arg4[%c0, %c0_0, %c0_1] : memref<1x120x128xf32, #tpu.memory_space<vmem>>, vector<1x16x64xf32>
    %1 = vector.shape_cast %0 : vector<1x16x64xf32> to vector<16x64xf32>
    %c0_2 = arith.constant 0 : index
    %c16 = arith.constant 16 : index
    %c0_3 = arith.constant 0 : index
    %2 = vector.load %arg4[%c0_2, %c16, %c0_3] : memref<1x120x128xf32, #tpu.memory_space<vmem>>, vector<1x8x64xf32>
    %3 = vector.shape_cast %2 : vector<1x8x64xf32> to vector<8x64xf32>
    %c0_4 = arith.constant 0 : index
    %c24 = arith.constant 24 : index
    %c0_5 = arith.constant 0 : index
    %4 = vector.load %arg4[%c0_4, %c24, %c0_5] : memref<1x120x128xf32, #tpu.memory_space<vmem>>, vector<1x1x64xf32>
    %5 = vector.shape_cast %4 : vector<1x1x64xf32> to vector<1x64xf32>
    %c0_6 = arith.constant 0 : index
    %c32 = arith.constant 32 : index
    %c0_7 = arith.constant 0 : index
    %6 = vector.load %arg4[%c0_6, %c32, %c0_7] : memref<1x120x128xf32, #tpu.memory_space<vmem>>, vector<1x64x32xf32>
    %7 = vector.shape_cast %6 : vector<1x64x32xf32> to vector<64x32xf32>
    %c0_8 = arith.constant 0 : index
    %c96 = arith.constant 96 : index
    %c0_9 = arith.constant 0 : index
    %8 = vector.load %arg4[%c0_8, %c96, %c0_9] : memref<1x120x128xf32, #tpu.memory_space<vmem>>, vector<1x1x32xf32>
    %9 = vector.shape_cast %8 : vector<1x1x32xf32> to vector<1x32xf32>
    %c0_10 = arith.constant 0 : index
    %c104 = arith.constant 104 : index
    %c0_11 = arith.constant 0 : index
    %10 = vector.load %arg4[%c0_10, %c104, %c0_11] : memref<1x120x128xf32, #tpu.memory_space<vmem>>, vector<1x1x32xf32>
    %11 = vector.shape_cast %10 : vector<1x1x32xf32> to vector<1x32xf32>
    %c0_12 = arith.constant 0 : index
    %c112 = arith.constant 112 : index
    %c0_13 = arith.constant 0 : index
    %12 = vector.load %arg4[%c0_12, %c112, %c0_13] : memref<1x120x128xf32, #tpu.memory_space<vmem>>, vector<1x1x1xf32>
    %13 = vector.shape_cast %12 : vector<1x1x1xf32> to vector<1x1xf32>
    %c0_14 = arith.constant 0 : index
    %c0_15 = arith.constant 0 : index
    %14 = vector.load %arg2[%c0_14, %c0_15] : memref<512x16xf32, #tpu.memory_space<vmem>>, vector<512x16xf32>
    %cst = arith.constant dense<0.000000e+00> : vector<512x64xf32>
    %15 = tpu.matmul %14, %1, %cst {dimension_numbers = #tpu.dot_dimension_numbers<[1], [0], [0], [1], [0, 0, 1, 1], [], []>} : vector<512x16xf32>, vector<16x64xf32>, vector<512x64xf32> -> vector<512x64xf32>
    %c0_16 = arith.constant 0 : index
    %c0_17 = arith.constant 0 : index
    %16 = vector.load %arg3[%c0_16, %c0_17] : memref<512x8xf32, #tpu.memory_space<vmem>>, vector<512x8xf32>
    %cst_18 = arith.constant dense<0.000000e+00> : vector<512x64xf32>
    %17 = tpu.matmul %16, %3, %cst_18 {dimension_numbers = #tpu.dot_dimension_numbers<[1], [0], [0], [1], [0, 0, 1, 1], [], []>} : vector<512x8xf32>, vector<8x64xf32>, vector<512x64xf32> -> vector<512x64xf32>
    %18 = arith.addf %15, %17 : vector<512x64xf32>
    %19 = vector.broadcast %5 : vector<1x64xf32> to vector<512x64xf32>
    %20 = arith.addf %18, %19 : vector<512x64xf32>
    %cst_19 = arith.constant 0.000000e+00 : f32
    %21 = vector.broadcast %cst_19 : f32 to vector<512x64xf32>
    %22 = arith.maximumf %20, %21 : vector<512x64xf32>
    %cst_20 = arith.constant dense<0.000000e+00> : vector<512x32xf32>
    %23 = tpu.matmul %22, %7, %cst_20 {dimension_numbers = #tpu.dot_dimension_numbers<[1], [0], [0], [1], [0, 0, 1, 1], [], []>} : vector<512x64xf32>, vector<64x32xf32>, vector<512x32xf32> -> vector<512x32xf32>
    %24 = vector.broadcast %9 : vector<1x32xf32> to vector<512x32xf32>
    %25 = arith.addf %23, %24 : vector<512x32xf32>
    %cst_21 = arith.constant 0.000000e+00 : f32
    %26 = vector.broadcast %cst_21 : f32 to vector<512x32xf32>
    %27 = arith.maximumf %25, %26 : vector<512x32xf32>
    %28 = vector.broadcast %11 : vector<1x32xf32> to vector<512x32xf32>
    %29 = arith.mulf %27, %28 : vector<512x32xf32>
    %cst_22 = arith.constant dense<0.000000e+00> : vector<512xf32>
    %30 = vector.multi_reduction <add>, %29, %cst_22 [1] : vector<512x32xf32> to vector<512xf32>
    %31 = vector.shape_cast %30 : vector<512xf32> to vector<512x1xf32>
    %32 = vector.broadcast %13 : vector<1x1xf32> to vector<512x1xf32>
    %33 = arith.addf %31, %32 : vector<512x1xf32>
    %c0_23 = arith.constant 0 : index
    %c0_24 = arith.constant 0 : index
    %c0_25 = arith.constant 0 : index
    %34 = vector.load %arg5[%c0_23, %c0_24, %c0_25] : memref<1x512x1xf32, #tpu.memory_space<vmem>>, vector<1x512x1xf32>
    %35 = vector.shape_cast %34 : vector<1x512x1xf32> to vector<512x1xf32>
    %36 = vector.shape_cast %33 : vector<512x1xf32> to vector<1x512x1xf32>
    tpu.vector_store %arg5[%c0_23, %c0_24, %c0_25], %36 {strides = array<i32>} : memref<1x512x1xf32, #tpu.memory_space<vmem>>, vector<1x512x1xf32>,
    return
  }
  func.func @transform_0(%arg0: i32, %arg1: i32) -> (i32, i32) {
    %c0_i32 = arith.constant 0 : i32
    %c0_i32_0 = arith.constant 0 : i32
    return %arg0, %c0_i32 : i32, i32
  }
  func.func @transform_1(%arg0: i32, %arg1: i32) -> (i32, i32) {
    %c0_i32 = arith.constant 0 : i32
    %c0_i32_0 = arith.constant 0 : i32
    return %arg0, %c0_i32 : i32, i32
  }
  func.func @transform_2(%arg0: i32, %arg1: i32) -> (i32, i32, i32) {
    %c0_i32 = arith.constant 0 : i32
    %c0_i32_0 = arith.constant 0 : i32
    %c0_i32_1 = arith.constant 0 : i32
    return %arg1, %c0_i32, %c0_i32_0 : i32, i32, i32
  }
  func.func @transform_3(%arg0: i32, %arg1: i32) -> (i32, i32, i32) {
    %c0_i32 = arith.constant 0 : i32
    %c0_i32_0 = arith.constant 0 : i32
    return %arg1, %arg0, %c0_i32 : i32, i32, i32
  }
}

</mosaic_0001>

<bundles_post_ra>
// kernel: critic_forward.1
= control target key start
LH: loop header
LB: loop body
LE: loop exit
PB: predicated region body
PF: predicated region fallthrough
CT: control target
= control target key end

     0   :  { %vm157_vm0 = vcmask 64512   ;;  %vm735_vm1 = vcmask 130048   ;;  %vm1449_vm2 = vcmask 523264   ;;  %vm2159_vm3 = vcmask 261120   ;;  %s4605_s2 = inlined_call_operand.vmem [shape: f32[1,120,128], index: 2, kind: input, shape index: {}]   ;;  %s4606_s1 = inlined_call_operand.vmem [shape: f32[512,8], index: 1, kind: input, shape index: {}]   ;;  %s4607_s0 = inlined_call_operand.vmem [shape: f32[512,16], index: 0, kind: input, shape index: {}]   ;;  %s4608_s3 = inlined_call_operand.vmem [shape: f32[1,512,1], index: 3, kind: output, shape index: {}]  }
   0x1   :  { %v16_v0 = vld [vmem:[%s4605_s2 + $0x10] sm:$0xff]  ;;  %v93_v1 = vld [vmem:[%s4606_s1] sm:$0xff]  ;;  %v94_v2 = vld [vmem:[%s4606_s1 + $0x8] sm:$0xff]  ;;  %vm2420_vm4 = vcmask 7168  }
   0x2   :  { %2888 = vmatprep.subr.mxu0 %v16_v0  ;;  %2890 = vmatprep.mubr.msk.f32.mxu0 %vm157_vm0, %v93_v1  ;;  %v14_v3 = vld [vmem:[%s4605_s2] sm:$0xff]  ;;  %v15_v4 = vld [vmem:[%s4605_s2 + $0x8] sm:$0xff]  ;;  %v95_v5 = vld [vmem:[%s4606_s1 + $0x10] sm:$0xff] }
   0x3   :  { %2889 = vmatpush3.msra.mxu0 %v16_v0  ;;  %v3198_v6 = vpack.c.bf16 %v15_v4, %v14_v3  ;;  %3218 = vmatprep.subr.mxu1 %v16_v0  ;;  %v96_v7 = vld [vmem:[%s4606_s1 + $0x18] sm:$0xff]  ;;  %v97_v8 = vld [vmem:[%s4606_s1 + $0x20] sm:$0xff]  ;;  %v98_v9 = vld [vmem:[%s4606_s1 + $0x28] sm:$0xff] }
   0x4   :  { %2891 = vmatmul.mubr.msk.f32.vlgmr.msra.gmra.mrb[0].mxu0 %vm157_vm0, %v94_v2  ;;  %3219 = vmatpush3.msra.mxu1 %v16_v0  ;;  %v99_v10 = vld [vmem:[%s4606_s1 + $0x30] sm:$0xff]  ;;  %v100_v11 = vld [vmem:[%s4606_s1 + $0x38] sm:$0xff]  ;;  %v101_v12 = vld [vmem:[%s4606_s1 + $0x40] sm:$0xff] }
   0x5   :  { %3199 = vmatprep.subr.bf16.mxu0 %v3198_v6  ;;  %2893 = vmatprep.mubr.msk.f32.mxu0 %vm157_vm0, %v95_v5  ;;  %v102_v13 = vld [vmem:[%s4606_s1 + $0x48] sm:$0xff]  ;;  %v103_v14 = vld [vmem:[%s4606_s1 + $0x50] sm:$0xff]  ;;  %v104_v15 = vld [vmem:[%s4606_s1 + $0x58] sm:$0xff] }
   0x6   :  { %3201 = vmatpush3.bf16.msra.mxu0 %v3198_v6  ;;  %v105_v16 = vld [vmem:[%s4606_s1 + $0x60] sm:$0xff]  ;;  %v126_v18 = vld [vmem:[%s4606_s1 + $0x108] sm:$0xff]  ;;  %v127_v19 = vld [vmem:[%s4606_s1 + $0x110] sm:$0xff] }
   0x7   :  { %v125_v17 = vld [vmem:[%s4606_s1 + $0x100] sm:$0xff]  ;;  %v106_v20 = vld [vmem:[%s4606_s1 + $0x68] sm:$0xff]  ;;  %v107_v21 = vld [vmem:[%s4606_s1 + $0x70] sm:$0xff] }
   0x8   :  { %2894 = vmatmul.mubr.msk.f32.gmra.mrb[2].mxu0 %vm157_vm0, %v96_v7  ;;  %2938 = vmatprep.mubr.msk.f32.mxu1 %vm157_vm0, %v125_v17  ;;  %v128_v22 = vld [vmem:[%s4606_s1 + $0x118] sm:$0xff]  ;;  %v129_v23 = vld [vmem:[%s4606_s1 + $0x120] sm:$0xff]  ;;  %v130_v26 = vld [vmem:[%s4606_s1 + $0x128] sm:$0xff] }
   0x9   :  { %2896 = vmatprep.mubr.msk.f32.mxu0 %vm157_vm0, %v97_v8  ;;  %2939 = vmatmul.mubr.msk.f32.vlgmr.msra.gmra.mrb[0].mxu1 %vm157_vm0, %v126_v18  ;;  %v108_v24 = vld [vmem:[%s4606_s1 + $0x78] sm:$0xff]  ;;  %v109_v25 = vld [vmem:[%s4606_s1 + $0x80] sm:$0xff]  ;;  %v131_v27 = vld [vmem:[%s4606_s1 + $0x130] sm:$0xff] }
   0xa   :  { %2941 = vmatprep.mubr.msk.f32.mxu1 %vm157_vm0, %v127_v19  ;;  %v110_v28 = vld [vmem:[%s4606_s1 + $0x88] sm:$0xff]  ;;  %v111_v29 = vld [vmem:[%s4606_s1 + $0x90] sm:$0xff]  ;;  %v132_v30 = vld [vmem:[%s4606_s1 + $0x138] sm:$0xff] }
   0xb   :  { %v133_v31 = vld [vmem:[%s4606_s1 + $0x140] sm:$0xff]  ;;  %v112_v32 = vld [vmem:[%s4606_s1 + $0x98] sm:$0xff]  ;;  %v134_v34 = vld [vmem:[%s4606_s1 + $0x148] sm:$0xff] }
   0xc   :  { %2897 = vmatmul.mubr.msk.f32.gmra.mrb[4].mxu0 %vm157_vm0, %v98_v9  ;;  %v113_v33 = vld [vmem:[%s4606_s1 + $0xa0] sm:$0xff]  ;;  %v135_v35 = vld [vmem:[%s4606_s1 + $0x150] sm:$0xff]  ;;  %v114_v36 = vld [vmem:[%s4606_s1 + $0xa8] sm:$0xff] }
   0xd   :  { %2899 = vmatprep.mubr.msk.f32.mxu0 %vm157_vm0, %v99_v10  ;;  %2942 = vmatmul.mubr.msk.f32.gmra.mrb[2].mxu1 %vm157_vm0, %v128_v22  ;;  %v115_v37 = vld [vmem:[%s4606_s1 + $0xb0] sm:$0xff]  ;;  %v136_v38 = vld [vmem:[%s4606_s1 + $0x158] sm:$0xff]  ;;  %v137_v39 = vld [vmem:[%s4606_s1 + $0x160] sm:$0xff] }
   0xe   :  { %2944 = vmatprep.mubr.msk.f32.mxu1 %vm157_vm0, %v129_v23  ;;  %v116_v40 = vld [vmem:[%s4606_s1 + $0xb8] sm:$0xff]  ;;  %v117_v41 = vld [vmem:[%s4606_s1 + $0xc0] sm:$0xff]  ;;  %v138_v42 = vld [vmem:[%s4606_s1 + $0x168] sm:$0xff] }
   0xf   :  { %v139_v43 = vld [vmem:[%s4606_s1 + $0x170] sm:$0xff]  ;;  %v118_v44 = vld [vmem:[%s4606_s1 + $0xc8] sm:$0xff]  ;;  %v140_v46 = vld [vmem:[%s4606_s1 + $0x178] sm:$0xff] }
  0x10   :  { %2900 = vmatmul.mubr.msk.f32.gmra.mrb[6].mxu0 %vm157_vm0, %v100_v11  ;;  %v119_v45 = vld [vmem:[%s4606_s1 + $0xd0] sm:$0xff]  ;;  %v141_v47 = vld [vmem:[%s4606_s1 + $0x180] sm:$0xff]  ;;  %v120_v48 = vld [vmem:[%s4606_s1 + $0xd8] sm:$0xff] }
  0x11   :  { %2902 = vmatprep.mubr.msk.f32.mxu0 %vm157_vm0, %v101_v12  ;;  %2945 = vmatmul.mubr.msk.f32.gmra.mrb[4].mxu1 %vm157_vm0, %v130_v26  ;;  %v121_v49 = vld [vmem:[%s4606_s1 + $0xe0] sm:$0xff]  ;;  %v142_v50 = vld [vmem:[%s4606_s1 + $0x188] sm:$0xff]  ;;  %v143_v51 = vld [vmem:[%s4606_s1 + $0x190] sm:$0xff] }
  0x12   :  { %2947 = vmatprep.mubr.msk.f32.mxu1 %vm157_vm0, %v131_v27  ;;  %v122_v52 = vld [vmem:[%s4606_s1 + $0xe8] sm:$0xff]  ;;  %v123_v53 = vld [vmem:[%s4606_s1 + $0xf0] sm:$0xff]  ;;  %v144_v54 = vld [vmem:[%s4606_s1 + $0x198] sm:$0xff] }
  0x13   :  { %v145_v55 = vld [vmem:[%s4606_s1 + $0x1a0] sm:$0xff]  ;;  %v124_v56 = vld [vmem:[%s4606_s1 + $0xf8] sm:$0xff]  ;;  %v146_v58 = vld [vmem:[%s4606_s1 + $0x1a8] sm:$0xff] }
  0x14   :  { %2903 = vmatmul.mubr.msk.f32.gmra.mrb[8].mxu0 %vm157_vm0, %v102_v13  ;;  %v29_v57 = vld [vmem:[%s4607_s0] sm:$0xff]  ;;  %v147_v59 = vld [vmem:[%s4606_s1 + $0x1b0] sm:$0xff]  ;;  %v19_v61 = vld [vmem:[%s4605_s2 + $0x28] sm:$0xff] }
  0x15   :  { %2905 = vmatprep.mubr.msk.f32.mxu0 %vm157_vm0, %v103_v14  ;;  %2948 = vmatmul.mubr.msk.f32.gmra.mrb[6].mxu1 %vm157_vm0, %v132_v30  ;;  %v18_v60 = vld [vmem:[%s4605_s2 + $0x20] sm:$0xff]  ;;  %v20_v62 = vld [vmem:[%s4605_s2 + $0x30] sm:$0xff]  ;;  %v30_v63 = vld [vmem:[%s4607_s0 + $0x8] sm:$0xff] }
  0x16   :  { %2950 = vmatprep.mubr.msk.f32.mxu1 %vm157_vm0, %v133_v31  ;;  %v3202_v0 = vpack.c.bf16 %v19_v61, %v18_v60  ;;  %v21_v1 = vld [vmem:[%s4605_s2 + $0x38] sm:$0xff]  ;;  %v31_v2 = vld [vmem:[%s4607_s0 + $0x10] sm:$0xff]  ;;  %v149_v5 = vld [vmem:[%s4606_s1 + $0x1c0] sm:$0xff] }
  0x17   :  { %v148_v3 = vld [vmem:[%s4606_s1 + $0x1b8] sm:$0xff]  ;;  %v3206_v4 = vpack.c.bf16 %v21_v1, %v20_v62  ;;  %v22_v6 = vld [vmem:[%s4605_s2 + $0x40] sm:$0xff]  ;;  %v23_v7 = vld [vmem:[%s4605_s2 + $0x48] sm:$0xff] }
  0x18   :  { %2906 = vmatmul.mubr.msk.f32.gmra.mrb[10].mxu0 %vm157_vm0, %v104_v15  ;;  %3203 = vmatprep.subr.bf16.mxu1 %v3202_v0  ;;  %v32_v8 = vld [vmem:[%s4607_s0 + $0x18] sm:$0xff]  ;;  %v33_v9 = vld [vmem:[%s4607_s0 + $0x20] sm:$0xff]  ;;  %v150_v10 = vld [vmem:[%s4606_s1 + $0x1c8] sm:$0xff]  ;;  %v3210_v11 = vpack.c.bf16 %v23_v7, %v22_v6 }
  0x19   :  { %2908 = vmatprep.mubr.msk.f32.mxu0 %vm157_vm0, %v105_v16  ;;  %2951 = vmatmul.mubr.msk.f32.gmra.mrb[8].mxu1 %vm157_vm0, %v134_v34  ;;  %v151_v12 = vld [vmem:[%s4606_s1 + $0x1d0] sm:$0xff]  ;;  %v25_v14 = vld [vmem:[%s4605_s2 + $0x58] sm:$0xff]  ;;  %v34_v15 = vld [vmem:[%s4607_s0 + $0x28] sm:$0xff] }
  0x1a   :  { %2953 = vmatprep.mubr.msk.f32.mxu1 %vm157_vm0, %v135_v35  ;;  %3205 = vmatpush3.bf16.msra.mxu1 %v3202_v0  ;;  %v24_v13 = vld [vmem:[%s4605_s2 + $0x50] sm:$0xff]  ;;  %v152_v17 = vld [vmem:[%s4606_s1 + $0x1d8] sm:$0xff]  ;;  %v153_v19 = vld [vmem:[%s4606_s1 + $0x1e0] sm:$0xff] }
  0x1b   :  { %3207 = vmatprep.subr.bf16.mxu1 %v3206_v4  ;;  %v35_v16 = vld [vmem:[%s4607_s0 + $0x30] sm:$0xff]  ;;  %v3214_v18 = vpack.c.bf16 %v25_v14, %v24_v13  ;;  %v154_v22 = vld [vmem:[%s4606_s1 + $0x1e8] sm:$0xff]  ;;  %v156_v26 = vld [vmem:[%s4606_s1 + $0x1f8] sm:$0xff] }
  0x1c   :  { %2909 = vmatmul.mubr.msk.f32.gmra.mrb[12].mxu0 %vm157_vm0, %v106_v20  ;;  %v36_v20 = vld [vmem:[%s4607_s0 + $0x38] sm:$0xff]  ;;  %v155_v23 = vld [vmem:[%s4606_s1 + $0x1f0] sm:$0xff]  ;;  %v73_v60 = vld [vmem:[%s4607_s0 + $0x160] sm:$0xff] }
  0x1d   :  { %2911 = vmatprep.mubr.msk.f32.mxu0 %vm157_vm0, %v107_v21  ;;  %2954 = vmatmul.mubr.msk.f32.gmra.mrb[10].mxu1 %vm157_vm0, %v136_v38  ;;  %v37_v21 = vld [vmem:[%s4607_s0 + $0x40] sm:$0xff]  ;;  %v40_v27 = vld [vmem:[%s4607_s0 + $0x58] sm:$0xff]  ;;  %v43_v30 = vld [vmem:[%s4607_s0 + $0x70] sm:$0xff] }
  0x1e   :  { %2956 = vmatprep.mubr.msk.f32.mxu1 %vm157_vm0, %v137_v39  ;;  %3209 = vmatpush3.bf16.msra.mxu1 %v3206_v4  ;;  %v44_v31 = vld [vmem:[%s4607_s0 + $0x78] sm:$0xff]  ;;  %v47_v34 = vld [vmem:[%s4607_s0 + $0x90] sm:$0xff]  ;;  %v74_v61 = vld [vmem:[%s4607_s0 + $0x168] sm:$0xff] }
  0x1f   :  { %3211 = vmatprep.subr.bf16.mxu1 %v3210_v11  ;;  %v48_v35 = vld [vmem:[%s4607_s0 + $0x98] sm:$0xff]  ;;  %v51_v38 = vld [vmem:[%s4607_s0 + $0xb0] sm:$0xff]  ;;  %v77_v0 = vld [vmem:[%s4607_s0 + $0x180] sm:$0xff] }
  0x20   :  { %2912 = vmatmul.mubr.msk.f32.gmra.mrb[14].mxu0 %vm157_vm0, %v108_v24  ;;  %v38_v24 = vld [vmem:[%s4607_s0 + $0x48] sm:$0xff]  ;;  %v52_v39 = vld [vmem:[%s4607_s0 + $0xb8] sm:$0xff]  ;;  %v75_v62 = vld [vmem:[%s4607_s0 + $0x170] sm:$0xff] }
  0x21   :  { %2914 = vmatprep.mubr.msk.f32.mxu0 %vm157_vm0, %v109_v25  ;;  %2957 = vmatmul.mubr.msk.f32.gmra.mrb[12].mxu1 %vm157_vm0, %v138_v42  ;;  %v39_v25 = vld [vmem:[%s4607_s0 + $0x50] sm:$0xff]  ;;  %v78_v1 = vld [vmem:[%s4607_s0 + $0x188] sm:$0xff]  ;;  %v81_v4 = vld [vmem:[%s4607_s0 + $0x1a0] sm:$0xff] }
  0x22   :  { %2959 = vmatprep.mubr.msk.f32.mxu1 %vm157_vm0, %v139_v43  ;;  %3213 = vmatpush3.bf16.msra.mxu1 %v3210_v11  ;;  %v55_v42 = vld [vmem:[%s4607_s0 + $0xd0] sm:$0xff]  ;;  %v56_v43 = vld [vmem:[%s4607_s0 + $0xd8] sm:$0xff]  ;;  %v90_v13 = vld [vmem:[%s4607_s0 + $0x1e8] sm:$0xff] }
  0x23   :  { %3215 = vmatprep.subr.bf16.mxu1 %v3214_v18  ;;  %v83_v6 = vld [vmem:[%s4607_s0 + $0x1b0] sm:$0xff]  ;;  %v84_v7 = vld [vmem:[%s4607_s0 + $0x1b8] sm:$0xff] }
  0x24   :  { %2915 = vmatmul.mubr.msk.f32.gmra.mrb[16].mxu0 %vm157_vm0, %v110_v28  ;;  %v41_v28 = vld [vmem:[%s4607_s0 + $0x60] sm:$0xff]  ;;  %v88_v11 = vld [vmem:[%s4607_s0 + $0x1d8] sm:$0xff]  ;;  %v91_v14 = vld [vmem:[%s4607_s0 + $0x1f0] sm:$0xff] }
  0x25   :  { %2917 = vmatprep.mubr.msk.f32.mxu0 %vm157_vm0, %v111_v29  ;;  %2960 = vmatmul.mubr.msk.f32.gmra.mrb[14].mxu1 %vm157_vm0, %v140_v46  ;;  %v42_v29 = vld [vmem:[%s4607_s0 + $0x68] sm:$0xff]  ;;  %v59_v46 = vld [vmem:[%s4607_s0 + $0xf0] sm:$0xff] }
  0x26   :  { %2962 = vmatprep.mubr.msk.f32.mxu1 %vm157_vm0, %v141_v47  ;;  %3217 = vmatpush3.bf16.msra.mxu1 %v3214_v18  ;;  %v60_v47 = vld [vmem:[%s4607_s0 + $0xf8] sm:$0xff] }
  0x28   :  { %2918 = vmatmul.mubr.msk.f32.gmra.mrb[18].mxu0 %vm157_vm0, %v112_v32  ;;  %v45_v32 = vld [vmem:[%s4607_s0 + $0x80] sm:$0xff] }
  0x29   :  { %2920 = vmatprep.mubr.msk.f32.mxu0 %vm157_vm0, %v113_v33  ;;  %2963 = vmatmul.mubr.msk.f32.gmra.mrb[16].mxu1 %vm157_vm0, %v142_v50  ;;  %v46_v33 = vld [vmem:[%s4607_s0 + $0x88] sm:$0xff]  ;;  %v63_v50 = vld [vmem:[%s4607_s0 + $0x110] sm:$0xff] }
  0x2a   :  { %2965 = vmatprep.mubr.msk.f32.mxu1 %vm157_vm0, %v143_v51  ;;  %v64_v51 = vld [vmem:[%s4607_s0 + $0x118] sm:$0xff] }
  0x2c   :  { %2921 = vmatmul.mubr.msk.f32.gmra.mrb[20].mxu0 %vm157_vm0, %v114_v36  ;;  %v49_v36 = vld [vmem:[%s4607_s0 + $0xa0] sm:$0xff] }
  0x2d   :  { %2923 = vmatprep.mubr.msk.f32.mxu0 %vm157_vm0, %v115_v37  ;;  %2966 = vmatmul.mubr.msk.f32.gmra.mrb[18].mxu1 %vm157_vm0, %v144_v54  ;;  %v50_v37 = vld [vmem:[%s4607_s0 + $0xa8] sm:$0xff]  ;;  %v67_v54 = vld [vmem:[%s4607_s0 + $0x130] sm:$0xff] }
  0x2e   :  { %2968 = vmatprep.mubr.msk.f32.mxu1 %vm157_vm0, %v145_v55  ;;  %v68_v55 = vld [vmem:[%s4607_s0 + $0x138] sm:$0xff] }
  0x30   :  { %2924 = vmatmul.mubr.msk.f32.gmra.mrb[22].mxu0 %vm157_vm0, %v116_v40  ;;  %v53_v40 = vld [vmem:[%s4607_s0 + $0xc0] sm:$0xff] }
  0x31   :  { %2926 = vmatprep.mubr.msk.f32.mxu0 %vm157_vm0, %v117_v41  ;;  %2969 = vmatmul.mubr.msk.f32.gmra.mrb[20].mxu1 %vm157_vm0, %v146_v58  ;;  %v54_v41 = vld [vmem:[%s4607_s0 + $0xc8] sm:$0xff]  ;;  %v71_v58 = vld [vmem:[%s4607_s0 + $0x150] sm:$0xff] }
  0x32   :  { %2971 = vmatprep.mubr.msk.f32.mxu1 %vm157_vm0, %v147_v59  ;;  %v72_v59 = vld [vmem:[%s4607_s0 + $0x158] sm:$0xff] }
  0x34   :  { %2927 = vmatmul.mubr.msk.f32.gmra.mrb[24].mxu0 %vm157_vm0, %v118_v44  ;;  %v57_v44 = vld [vmem:[%s4607_s0 + $0xe0] sm:$0xff] }
  0x35   :  { %2929 = vmatprep.mubr.msk.f32.mxu0 %vm157_vm0, %v119_v45  ;;  %2972 = vmatmul.mubr.msk.f32.gmra.mrb[22].mxu1 %vm157_vm0, %v148_v3  ;;  %v58_v45 = vld [vmem:[%s4607_s0 + $0xe8] sm:$0xff]  ;;  %v80_v3 = vld [vmem:[%s4607_s0 + $0x198] sm:$0xff] }
  0x36   :  { %2974 = vmatprep.mubr.msk.f32.mxu1 %vm157_vm0, %v149_v5  ;;  %v82_v5 = vld [vmem:[%s4607_s0 + $0x1a8] sm:$0xff] }
  0x38   :  { %2930 = vmatmul.mubr.msk.f32.gmra.mrb[26].mxu0 %vm157_vm0, %v120_v48  ;;  %v61_v48 = vld [vmem:[%s4607_s0 + $0x100] sm:$0xff] }
  0x39   :  { %2932 = vmatprep.mubr.msk.f32.mxu0 %vm157_vm0, %v121_v49  ;;  %2975 = vmatmul.mubr.msk.f32.gmra.mrb[24].mxu1 %vm157_vm0, %v150_v10  ;;  %v62_v49 = vld [vmem:[%s4607_s0 + $0x108] sm:$0xff]  ;;  %v87_v10 = vld [vmem:[%s4607_s0 + $0x1d0] sm:$0xff] }
  0x3a   :  { %2977 = vmatprep.mubr.msk.f32.mxu1 %vm157_vm0, %v151_v12  ;;  %v89_v12 = vld [vmem:[%s4607_s0 + $0x1e0] sm:$0xff] }
  0x3c   :  { %2933 = vmatmul.mubr.msk.f32.gmra.mrb[28].mxu0 %vm157_vm0, %v122_v52  ;;  %v65_v52 = vld [vmem:[%s4607_s0 + $0x120] sm:$0xff] }
  0x3d   :  { %2935 = vmatprep.mubr.msk.f32.mxu0 %vm157_vm0, %v123_v53  ;;  %2978 = vmatmul.mubr.msk.f32.gmra.mrb[26].mxu1 %vm157_vm0, %v152_v17  ;;  %v66_v53 = vld [vmem:[%s4607_s0 + $0x128] sm:$0xff] }
  0x3e   :  { %2980 = vmatprep.mubr.msk.f32.mxu1 %vm157_vm0, %v153_v19 }
  0x40   :  { %2936 = vmatmul.mubr.msk.f32.gmra.mrb[30].mxu0 %vm157_vm0, %v124_v56  ;;  %v69_v56 = vld [vmem:[%s4607_s0 + $0x140] sm:$0xff] }
  0x41   :  { %2990 = vmatprep.mubr.msk.f32.mxu0 %vm735_vm1, %v29_v57  ;;  %2981 = vmatmul.mubr.msk.f32.gmra.mrb[28].mxu1 %vm157_vm0, %v154_v22  ;;  %v70_v57 = vld [vmem:[%s4607_s0 + $0x148] sm:$0xff] }
  0x42   :  { %2983 = vmatprep.mubr.msk.f32.mxu1 %vm157_vm0, %v155_v23 }
  0x44   :  { %2991 = vmatmul.mubr.msk.f32.vlgmr.msra.gmra.mrb[0].mxu0 %vm735_vm1, %v30_v63  ;;  %v76_v63 = vld [vmem:[%s4607_s0 + $0x178] sm:$0xff] }
  0x45   :  { %2993 = vmatprep.mubr.msk.f32.mxu0 %vm735_vm1, %v31_v2  ;;  %2984 = vmatmul.mubr.msk.f32.gmra.mrb[30].mxu1 %vm157_vm0, %v156_v26  ;;  %v79_v2 = vld [vmem:[%s4607_s0 + $0x190] sm:$0xff] }
  0x48   :  { %2994 = vmatmul.mubr.msk.f32.gmra.mrb[2].mxu0 %vm735_vm1, %v32_v8  ;;  %v85_v8 = vld [vmem:[%s4607_s0 + $0x1c0] sm:$0xff] }
  0x49   :  { %2996 = vmatprep.mubr.msk.f32.mxu0 %vm735_vm1, %v33_v9  ;;  %v86_v9 = vld [vmem:[%s4607_s0 + $0x1c8] sm:$0xff] }
  0x4c   :  { %2997 = vmatmul.mubr.msk.f32.gmra.mrb[4].mxu0 %vm735_vm1, %v34_v15  ;;  %v92_v15 = vld [vmem:[%s4607_s0 + $0x1f8] sm:$0xff] }
  0x4d   :  { %2999 = vmatprep.mubr.msk.f32.mxu0 %vm735_vm1, %v35_v16 }
  0x50   :  { %3000 = vmatmul.mubr.msk.f32.gmra.mrb[6].mxu0 %vm735_vm1, %v36_v20 }
  0x51   :  { %3002 = vmatprep.mubr.msk.f32.mxu0 %vm735_vm1, %v37_v21 }
  0x54   :  { %3003 = vmatmul.mubr.msk.f32.gmra.mrb[8].mxu0 %vm735_vm1, %v38_v24 }
  0x55   :  { %3005 = vmatprep.mubr.msk.f32.mxu0 %vm735_vm1, %v39_v25 }
  0x58   :  { %3006 = vmatmul.mubr.msk.f32.gmra.mrb[10].mxu0 %vm735_vm1, %v40_v27 }
  0x59   :  { %3008 = vmatprep.mubr.msk.f32.mxu0 %vm735_vm1, %v41_v28 }
  0x5c   :  { %3009 = vmatmul.mubr.msk.f32.gmra.mrb[12].mxu0 %vm735_vm1, %v42_v29 }
  0x5d   :  { %3011 = vmatprep.mubr.msk.f32.mxu0 %vm735_vm1, %v43_v30 }
  0x60   :  { %3012 = vmatmul.mubr.msk.f32.gmra.mrb[14].mxu0 %vm735_vm1, %v44_v31 }
  0x61   :  { %3014 = vmatprep.mubr.msk.f32.mxu0 %vm735_vm1, %v45_v32 }
  0x64   :  { %3015 = vmatmul.mubr.msk.f32.gmra.mrb[16].mxu0 %vm735_vm1, %v46_v33 }
  0x65   :  { %3017 = vmatprep.mubr.msk.f32.mxu0 %vm735_vm1, %v47_v34 }
  0x68   :  { %3018 = vmatmul.mubr.msk.f32.gmra.mrb[18].mxu0 %vm735_vm1, %v48_v35 }
  0x69   :  { %3020 = vmatprep.mubr.msk.f32.mxu0 %vm735_vm1, %v49_v36 }
  0x6c   :  { %3021 = vmatmul.mubr.msk.f32.gmra.mrb[20].mxu0 %vm735_vm1, %v50_v37  ;;  %v3894_v37 = vld [vmem:[%s4605_s2 + $0x18] ss:$0 sm:$0xff] }
  0x6d   :  { %3023 = vmatprep.mubr.msk.f32.mxu0 %vm735_vm1, %v51_v38 }
  0x70   :  { %3024 = vmatmul.mubr.msk.f32.gmra.mrb[22].mxu0 %vm735_vm1, %v52_v39 }
  0x71   :  { %3026 = vmatprep.mubr.msk.f32.mxu0 %vm735_vm1, %v53_v40 }
  0x74   :  { %3027 = vmatmul.mubr.msk.f32.gmra.mrb[24].mxu0 %vm735_vm1, %v54_v41 }
  0x75   :  { %3029 = vmatprep.mubr.msk.f32.mxu0 %vm735_vm1, %v55_v42 }
  0x78   :  { %3030 = vmatmul.mubr.msk.f32.gmra.mrb[26].mxu0 %vm735_vm1, %v56_v43 }
  0x79   :  { %3032 = vmatprep.mubr.msk.f32.mxu0 %vm735_vm1, %v57_v44 }
  0x7c   :  { %3033 = vmatmul.mubr.msk.f32.gmra.mrb[28].mxu0 %vm735_vm1, %v58_v45 }
  0x7d   :  { %3035 = vmatprep.mubr.msk.f32.mxu0 %vm735_vm1, %v59_v46 }
  0x80   :  { %3036 = vmatmul.mubr.msk.f32.gmra.mrb[30].mxu0 %vm735_vm1, %v60_v47 }
  0x81   :  { %3038 = vmatprep.mubr.msk.f32.mxu0 %vm735_vm1, %v61_v48 }
  0x84   :  { %3039 = vmatmul.mubr.msk.f32.gmra.mrb[32].mxu0 %vm735_vm1, %v62_v49 }
  0x85   :  { %3041 = vmatprep.mubr.msk.f32.mxu0 %vm735_vm1, %v63_v50 }
  0x88   :  { %3042 = vmatmul.mubr.msk.f32.gmra.mrb[34].mxu0 %vm735_vm1, %v64_v51 }
  0x89   :  { %3044 = vmatprep.mubr.msk.f32.mxu0 %vm735_vm1, %v65_v52 }
  0x8c   :  { %3045 = vmatmul.mubr.msk.f32.gmra.mrb[36].mxu0 %vm735_vm1, %v66_v53 }
  0x8d   :  { %3047 = vmatprep.mubr.msk.f32.mxu0 %vm735_vm1, %v67_v54 }
  0x90   :  { %3048 = vmatmul.mubr.msk.f32.gmra.mrb[38].mxu0 %vm735_vm1, %v68_v55 }
  0x91   :  { %3050 = vmatprep.mubr.msk.f32.mxu0 %vm735_vm1, %v69_v56 }
  0x94   :  { %3051 = vmatmul.mubr.msk.f32.gmra.mrb[40].mxu0 %vm735_vm1, %v70_v57 }
  0x95   :  { %3053 = vmatprep.mubr.msk.f32.mxu0 %vm735_vm1, %v71_v58 }
  0x98   :  { %3054 = vmatmul.mubr.msk.f32.gmra.mrb[42].mxu0 %vm735_vm1, %v72_v59 }
  0x99   :  { %3056 = vmatprep.mubr.msk.f32.mxu0 %vm735_vm1, %v73_v60 }
  0x9c   :  { %3057 = vmatmul.mubr.msk.f32.gmra.mrb[44].mxu0 %vm735_vm1, %v74_v61 }
  0x9d   :  { %3059 = vmatprep.mubr.msk.f32.mxu0 %vm735_vm1, %v75_v62 }
  0xa0   :  { %3060 = vmatmul.mubr.msk.f32.gmra.mrb[46].mxu0 %vm735_vm1, %v76_v63 }
  0xa1   :  { %3062 = vmatprep.mubr.msk.f32.mxu0 %vm735_vm1, %v77_v0 }
  0xa4   :  { %3063 = vmatmul.mubr.msk.f32.gmra.mrb[48].mxu0 %vm735_vm1, %v78_v1 }
  0xa5   :  { %3065 = vmatprep.mubr.msk.f32.mxu0 %vm735_vm1, %v79_v2 }
  0xa8   :  { %3066 = vmatmul.mubr.msk.f32.gmra.mrb[50].mxu0 %vm735_vm1, %v80_v3 }
  0xa9   :  { %3068 = vmatprep.mubr.msk.f32.mxu0 %vm735_vm1, %v81_v4 }
  0xac   :  { %3069 = vmatmul.mubr.msk.f32.gmra.mrb[52].mxu0 %vm735_vm1, %v82_v5 }
  0xad   :  { %3071 = vmatprep.mubr.msk.f32.mxu0 %vm735_vm1, %v83_v6 }
  0xb0   :  { %3072 = vmatmul.mubr.msk.f32.gmra.mrb[54].mxu0 %vm735_vm1, %v84_v7 }
  0xb1   :  { %3074 = vmatprep.mubr.msk.f32.mxu0 %vm735_vm1, %v85_v8 }
  0xb4   :  { %3075 = vmatmul.mubr.msk.f32.gmra.mrb[56].mxu0 %vm735_vm1, %v86_v9 }
  0xb5   :  { %3077 = vmatprep.mubr.msk.f32.mxu0 %vm735_vm1, %v87_v10 }
  0xb8   :  { %3078 = vmatmul.mubr.msk.f32.gmra.mrb[58].mxu0 %vm735_vm1, %v88_v11 }
  0xb9   :  { %3080 = vmatprep.mubr.msk.f32.mxu0 %vm735_vm1, %v89_v12 }
  0xbc   :  { %3081 = vmatmul.mubr.msk.f32.gmra.mrb[60].mxu0 %vm735_vm1, %v90_v13 }
  0xbd   :  { %3083 = vmatprep.mubr.msk.f32.mxu0 %vm735_vm1, %v91_v14 }
  0xc0   :  { %3084 = vmatmul.mubr.msk.f32.gmra.mrb[62].mxu0 %vm735_vm1, %v92_v15 }
  0xdc   :  { %v3849_v16 = vpop.f32.mrb[0].mxu1 }
  0xdd   :  { %v3851_v17 = vpop.f32.mrb[1].mxu1 }
  0xe0   :  { %v3853_v18 = vpop.f32.mrb[2].mxu1 }
  0xe1   :  { %v3855_v19 = vpop.f32.mrb[3].mxu1 }
  0xe4   :  { %v3857_v20 = vpop.f32.mrb[4].mxu1 }
  0xe5   :  { %v3859_v21 = vpop.f32.mrb[5].mxu1 }
  0xe8   :  { %v3861_v22 = vpop.f32.mrb[6].mxu1 }
  0xe9   :  { %v3863_v23 = vpop.f32.mrb[7].mxu1 }
  0xec   :  { %v3865_v24 = vpop.f32.mrb[8].mxu1 }
  0xed   :  { %v3867_v25 = vpop.f32.mrb[9].mxu1 }
  0xf0   :  { %v3869_v26 = vpop.f32.mrb[10].mxu1 }
  0xf1   :  { %v3871_v27 = vpop.f32.mrb[11].mxu1 }
  0xf4   :  { %v3873_v28 = vpop.f32.mrb[12].mxu1 }
  0xf5   :  { %v3875_v29 = vpop.f32.mrb[13].mxu1 }
  0xf8   :  { %v3877_v30 = vpop.f32.mrb[14].mxu1 }
  0xf9   :  { %v3879_v31 = vpop.f32.mrb[15].mxu1 }
  0xfc   :  { %v3881_v32 = vpop.f32.mrb[16].mxu1 }
  0xfd   :  { %v3883_v33 = vpop.f32.mrb[17].mxu1 }
 0x100   :  { %v3885_v34 = vpop.f32.mrb[18].mxu1 }
 0x101   :  { %v3887_v35 = vpop.f32.mrb[19].mxu1 }
 0x104   :  { %v3889_v36 = vpop.f32.mrb[20].mxu1 }
 0x105   :  { %v3896_v38 = vpop.f32.mrb[21].mxu1 }
 0x108   :  { %v3899_v42 = vpop.f32.mrb[22].mxu1 }
 0x109   :  { %v3902_v44 = vpop.f32.mrb[23].mxu1 }
 0x10c   :  { %v3905_v50 = vpop.f32.mrb[24].mxu1 }
 0x10d   :  { %v3909_v52 = vpop.f32.mrb[25].mxu1 }
 0x110   :  { %v3913_v58 = vpop.f32.mrb[26].mxu1 }
 0x111   :  { %v3917_v60 = vpop.f32.mrb[27].mxu1 }
 0x114   :  { %v3921_v2 = vpop.f32.mrb[28].mxu1 }
 0x115   :  { %v3925_v4 = vpop.f32.mrb[29].mxu1 }
 0x117   :  { %v2992_v39 = vpop.f32.mrb[0].mxu0 }
 0x118   :  { %v1318_v40 = vadd.f32 %v2992_v39, %v3894_v37  ;;  %v994_v41 = vpop.f32.mrb[1].mxu0  ;;  %v3929_v10 = vpop.f32.mrb[30].mxu1 }
 0x119   :  { %v1317_v43 = vadd.f32 %v3894_v37, %v994_v41  ;;  %v3933_v12 = vpop.f32.mrb[31].mxu1 }
 0x11a   :  { %v1382_v47 = vmax.f32 %v1318_v40, 0.0 }
 0x11b   :  { %v1381_v45 = vmax.f32 %v1317_v43, 0.0  ;;  %v2995_v46 = vpop.f32.mrb[2].mxu0 }
 0x11c   :  { %v1320_v48 = vadd.f32 %v2995_v46, %v3894_v37  ;;  %v1004_v49 = vpop.f32.mrb[3].mxu0 }
 0x11d   :  { %v1319_v51 = vadd.f32 %v3894_v37, %v1004_v49  ;;  %3102 = vmatprep.mubr.msk.f32.mxu1 %vm1449_vm2, %v1381_v45 }
 0x11e   :  { %3103 = vmatmul.mubr.msk.f32.vlgmr.msra.gmra.mrb[32].mxu1 %vm1449_vm2, %v1382_v47  ;;  %v1384_v55 = vmax.f32 %v1320_v48, 0.0 }
 0x11f   :  { %v1383_v53 = vmax.f32 %v1319_v51, 0.0  ;;  %v2998_v54 = vpop.f32.mrb[4].mxu0 }
 0x120   :  { %v1322_v56 = vadd.f32 %v2998_v54, %v3894_v37  ;;  %v1014_v57 = vpop.f32.mrb[5].mxu0 }
 0x121   :  { %v1321_v59 = vadd.f32 %v3894_v37, %v1014_v57  ;;  %3105 = vmatprep.mubr.msk.f32.mxu1 %vm1449_vm2, %v1383_v53 }
 0x122   :  { %3106 = vmatmul.mubr.msk.f32.gmra.mrb[34].mxu1 %vm1449_vm2, %v1384_v55  ;;  %v1386_v63 = vmax.f32 %v1322_v56, 0.0 }
 0x123   :  { %v1385_v61 = vmax.f32 %v1321_v59, 0.0  ;;  %v3001_v62 = vpop.f32.mrb[6].mxu0 }
 0x124   :  { %v1324_v0 = vadd.f32 %v3001_v62, %v3894_v37  ;;  %v1024_v1 = vpop.f32.mrb[7].mxu0 }
 0x125   :  { %v1323_v3 = vadd.f32 %v3894_v37, %v1024_v1  ;;  %3108 = vmatprep.mubr.msk.f32.mxu1 %vm1449_vm2, %v1385_v61 }
 0x126   :  { %3109 = vmatmul.mubr.msk.f32.gmra.mrb[36].mxu1 %vm1449_vm2, %v1386_v63  ;;  %v1388_v7 = vmax.f32 %v1324_v0, 0.0 }
 0x127   :  { %v1387_v5 = vmax.f32 %v1323_v3, 0.0  ;;  %v3004_v6 = vpop.f32.mrb[8].mxu0 }
 0x128   :  { %v1326_v8 = vadd.f32 %v3004_v6, %v3894_v37  ;;  %v1034_v9 = vpop.f32.mrb[9].mxu0 }
 0x129   :  { %v1325_v11 = vadd.f32 %v3894_v37, %v1034_v9  ;;  %3111 = vmatprep.mubr.msk.f32.mxu1 %vm1449_vm2, %v1387_v5 }
 0x12a   :  { %3112 = vmatmul.mubr.msk.f32.gmra.mrb[38].mxu1 %vm1449_vm2, %v1388_v7  ;;  %v1390_v15 = vmax.f32 %v1326_v8, 0.0 }
 0x12b   :  { %v1389_v13 = vmax.f32 %v1325_v11, 0.0  ;;  %v3007_v14 = vpop.f32.mrb[10].mxu0 }
 0x12c   :  { %v1328_v39 = vadd.f32 %v3007_v14, %v3894_v37  ;;  %v1044_v40 = vpop.f32.mrb[11].mxu0 }
 0x12d   :  { %v1327_v41 = vadd.f32 %v3894_v37, %v1044_v40  ;;  %3114 = vmatprep.mubr.msk.f32.mxu1 %vm1449_vm2, %v1389_v13 }
 0x12e   :  { %3115 = vmatmul.mubr.msk.f32.gmra.mrb[40].mxu1 %vm1449_vm2, %v1390_v15  ;;  %v1392_v46 = vmax.f32 %v1328_v39, 0.0 }
 0x12f   :  { %v1391_v43 = vmax.f32 %v1327_v41, 0.0  ;;  %v3010_v45 = vpop.f32.mrb[12].mxu0 }
 0x130   :  { %v1330_v47 = vadd.f32 %v3010_v45, %v3894_v37  ;;  %v1054_v48 = vpop.f32.mrb[13].mxu0 }
 0x131   :  { %v1329_v49 = vadd.f32 %v3894_v37, %v1054_v48  ;;  %3117 = vmatprep.mubr.msk.f32.mxu1 %vm1449_vm2, %v1391_v43 }
 0x132   :  { %3118 = vmatmul.mubr.msk.f32.gmra.mrb[42].mxu1 %vm1449_vm2, %v1392_v46  ;;  %v1394_v54 = vmax.f32 %v1330_v47, 0.0 }
 0x133   :  { %v1393_v51 = vmax.f32 %v1329_v49, 0.0  ;;  %v3013_v53 = vpop.f32.mrb[14].mxu0 }
 0x134   :  { %v1332_v55 = vadd.f32 %v3013_v53, %v3894_v37  ;;  %v1064_v56 = vpop.f32.mrb[15].mxu0 }
 0x135   :  { %v1331_v57 = vadd.f32 %v3894_v37, %v1064_v56  ;;  %3120 = vmatprep.mubr.msk.f32.mxu1 %vm1449_vm2, %v1393_v51 }
 0x136   :  { %3121 = vmatmul.mubr.msk.f32.gmra.mrb[44].mxu1 %vm1449_vm2, %v1394_v54  ;;  %v1396_v62 = vmax.f32 %v1332_v55, 0.0 }
 0x137   :  { %v1395_v59 = vmax.f32 %v1331_v57, 0.0  ;;  %v3016_v61 = vpop.f32.mrb[16].mxu0 }
 0x138   :  { %v1334_v63 = vadd.f32 %v3016_v61, %v3894_v37  ;;  %v1074_v0 = vpop.f32.mrb[17].mxu0 }
 0x139   :  { %v1333_v1 = vadd.f32 %v3894_v37, %v1074_v0  ;;  %3123 = vmatprep.mubr.msk.f32.mxu1 %vm1449_vm2, %v1395_v59 }
 0x13a   :  { %3124 = vmatmul.mubr.msk.f32.gmra.mrb[46].mxu1 %vm1449_vm2, %v1396_v62  ;;  %v1398_v6 = vmax.f32 %v1334_v63, 0.0 }
 0x13b   :  { %v1397_v3 = vmax.f32 %v1333_v1, 0.0  ;;  %v3019_v5 = vpop.f32.mrb[18].mxu0 }
 0x13c   :  { %v1336_v7 = vadd.f32 %v3019_v5, %v3894_v37  ;;  %v1084_v8 = vpop.f32.mrb[19].mxu0 }
 0x13d   :  { %v1335_v9 = vadd.f32 %v3894_v37, %v1084_v8  ;;  %3126 = vmatprep.mubr.msk.f32.mxu1 %vm1449_vm2, %v1397_v3 }
 0x13e   :  { %3127 = vmatmul.mubr.msk.f32.gmra.mrb[48].mxu1 %vm1449_vm2, %v1398_v6  ;;  %v1400_v14 = vmax.f32 %v1336_v7, 0.0 }
 0x13f   :  { %v1399_v11 = vmax.f32 %v1335_v9, 0.0  ;;  %v3022_v13 = vpop.f32.mrb[20].mxu0 }
 0x140   :  { %v1338_v15 = vadd.f32 %v3022_v13, %v3894_v37  ;;  %v1094_v39 = vpop.f32.mrb[21].mxu0 }
 0x141   :  { %v1337_v40 = vadd.f32 %v3894_v37, %v1094_v39  ;;  %3129 = vmatprep.mubr.msk.f32.mxu1 %vm1449_vm2, %v1399_v11 }
 0x142   :  { %3130 = vmatmul.mubr.msk.f32.gmra.mrb[50].mxu1 %vm1449_vm2, %v1400_v14  ;;  %v1402_v45 = vmax.f32 %v1338_v15, 0.0 }
 0x143   :  { %v1401_v41 = vmax.f32 %v1337_v40, 0.0  ;;  %v3025_v43 = vpop.f32.mrb[22].mxu0 }
 0x144   :  { %v1340_v46 = vadd.f32 %v3025_v43, %v3894_v37  ;;  %v1104_v47 = vpop.f32.mrb[23].mxu0 }
 0x145   :  { %v1339_v48 = vadd.f32 %v3894_v37, %v1104_v47  ;;  %3132 = vmatprep.mubr.msk.f32.mxu1 %vm1449_vm2, %v1401_v41 }
 0x146   :  { %3133 = vmatmul.mubr.msk.f32.gmra.mrb[52].mxu1 %vm1449_vm2, %v1402_v45  ;;  %v1404_v53 = vmax.f32 %v1340_v46, 0.0 }
 0x147   :  { %v1403_v49 = vmax.f32 %v1339_v48, 0.0  ;;  %v3028_v51 = vpop.f32.mrb[24].mxu0 }
 0x148   :  { %v1342_v54 = vadd.f32 %v3028_v51, %v3894_v37  ;;  %v1114_v55 = vpop.f32.mrb[25].mxu0 }
 0x149   :  { %v1341_v56 = vadd.f32 %v3894_v37, %v1114_v55  ;;  %3135 = vmatprep.mubr.msk.f32.mxu1 %vm1449_vm2, %v1403_v49 }
 0x14a   :  { %3136 = vmatmul.mubr.msk.f32.gmra.mrb[54].mxu1 %vm1449_vm2, %v1404_v53  ;;  %v1406_v61 = vmax.f32 %v1342_v54, 0.0 }
 0x14b   :  { %v1405_v57 = vmax.f32 %v1341_v56, 0.0  ;;  %v3031_v59 = vpop.f32.mrb[26].mxu0 }
 0x14c   :  { %v1344_v62 = vadd.f32 %v3031_v59, %v3894_v37  ;;  %v1124_v63 = vpop.f32.mrb[27].mxu0 }
 0x14d   :  { %v1343_v0 = vadd.f32 %v3894_v37, %v1124_v63  ;;  %3138 = vmatprep.mubr.msk.f32.mxu1 %vm1449_vm2, %v1405_v57 }
 0x14e   :  { %3139 = vmatmul.mubr.msk.f32.gmra.mrb[56].mxu1 %vm1449_vm2, %v1406_v61  ;;  %v1408_v5 = vmax.f32 %v1344_v62, 0.0 }
 0x14f   :  { %v1407_v1 = vmax.f32 %v1343_v0, 0.0  ;;  %v3034_v3 = vpop.f32.mrb[28].mxu0 }
 0x150   :  { %v1346_v6 = vadd.f32 %v3034_v3, %v3894_v37  ;;  %v1134_v7 = vpop.f32.mrb[29].mxu0 }
 0x151   :  { %v1345_v8 = vadd.f32 %v3894_v37, %v1134_v7  ;;  %3141 = vmatprep.mubr.msk.f32.mxu1 %vm1449_vm2, %v1407_v1 }
 0x152   :  { %3142 = vmatmul.mubr.msk.f32.gmra.mrb[58].mxu1 %vm1449_vm2, %v1408_v5  ;;  %v1410_v13 = vmax.f32 %v1346_v6, 0.0 }
 0x153   :  { %v1409_v9 = vmax.f32 %v1345_v8, 0.0  ;;  %v3037_v11 = vpop.f32.mrb[30].mxu0 }
 0x154   :  { %v1348_v14 = vadd.f32 %v3037_v11, %v3894_v37  ;;  %v1144_v15 = vpop.f32.mrb[31].mxu0 }
 0x155   :  { %v1347_v39 = vadd.f32 %v3894_v37, %v1144_v15  ;;  %3144 = vmatprep.mubr.msk.f32.mxu1 %vm1449_vm2, %v1409_v9 }
 0x156   :  { %3145 = vmatmul.mubr.msk.f32.gmra.mrb[60].mxu1 %vm1449_vm2, %v1410_v13  ;;  %v1412_v43 = vmax.f32 %v1348_v14, 0.0 }
 0x157   :  { %v1411_v40 = vmax.f32 %v1347_v39, 0.0  ;;  %v3040_v41 = vpop.f32.mrb[32].mxu0 }
 0x158   :  { %v1160_v45 = vadd.f32 %v3040_v41, %v3849_v16  ;;  %v1154_v46 = vpop.f32.mrb[33].mxu0 }
 0x159   :  { %v1155_v47 = vadd.f32 %v1154_v46, %v3851_v17  ;;  %3147 = vmatprep.mubr.msk.f32.mxu1 %vm1449_vm2, %v1411_v40 }
 0x15a   :  { %v1350_v48 = vadd.f32 %v3894_v37, %v1160_v45  ;;  %3148 = vmatmul.mubr.msk.f32.gmra.mrb[62].mxu1 %vm1449_vm2, %v1412_v43 }
 0x15b   :  { %v1349_v49 = vadd.f32 %v3894_v37, %v1155_v47  ;;  %v3043_v51 = vpop.f32.mrb[34].mxu0 }
 0x15c   :  { %v1414_v53 = vmax.f32 %v1350_v48, 0.0  ;;  %v1170_v54 = vadd.f32 %v3043_v51, %v3853_v18  ;;  %v1164_v55 = vpop.f32.mrb[35].mxu0 }
 0x15d   :  { %v1413_v56 = vmax.f32 %v1349_v49, 0.0  ;;  %v1165_v57 = vadd.f32 %v1164_v55, %v3855_v19 }
 0x15e   :  { %v1352_v16 = vadd.f32 %v3894_v37, %v1170_v54 }
 0x15f   :  { %v1351_v17 = vadd.f32 %v3894_v37, %v1165_v57  ;;  %v3046_v59 = vpop.f32.mrb[36].mxu0  ;;  %3150 = vmatprep.mubr.msk.f32.mxu1 %vm1449_vm2, %v1413_v56 }
 0x160   :  { %v1416_v61 = vmax.f32 %v1352_v16, 0.0  ;;  %v1180_v62 = vadd.f32 %v3046_v59, %v3857_v20  ;;  %v1174_v63 = vpop.f32.mrb[37].mxu0  ;;  %3151 = vmatmul.mubr.msk.f32.gmra.mrb[64].mxu1 %vm1449_vm2, %v1414_v53 }
 0x161   :  { %v1415_v0 = vmax.f32 %v1351_v17, 0.0  ;;  %v1175_v18 = vadd.f32 %v1174_v63, %v3859_v21 }
 0x162   :  { %v1354_v1 = vadd.f32 %v3894_v37, %v1180_v62 }
 0x163   :  { %v1353_v19 = vadd.f32 %v3894_v37, %v1175_v18  ;;  %v3049_v3 = vpop.f32.mrb[38].mxu0  ;;  %3153 = vmatprep.mubr.msk.f32.mxu1 %vm1449_vm2, %v1415_v0 }
 0x164   :  { %v1418_v5 = vmax.f32 %v1354_v1, 0.0  ;;  %v1190_v6 = vadd.f32 %v3049_v3, %v3861_v22  ;;  %v1184_v7 = vpop.f32.mrb[39].mxu0  ;;  %3154 = vmatmul.mubr.msk.f32.gmra.mrb[66].mxu1 %vm1449_vm2, %v1416_v61 }
 0x165   :  { %v1417_v20 = vmax.f32 %v1353_v19, 0.0  ;;  %v1185_v8 = vadd.f32 %v1184_v7, %v3863_v23 }
 0x166   :  { %v1356_v9 = vadd.f32 %v3894_v37, %v1190_v6 }
 0x167   :  { %v1355_v21 = vadd.f32 %v3894_v37, %v1185_v8  ;;  %v3052_v11 = vpop.f32.mrb[40].mxu0  ;;  %3156 = vmatprep.mubr.msk.f32.mxu1 %vm1449_vm2, %v1417_v20 }
 0x168   :  { %v1420_v13 = vmax.f32 %v1356_v9, 0.0  ;;  %v1200_v14 = vadd.f32 %v3052_v11, %v3865_v24  ;;  %v1194_v15 = vpop.f32.mrb[41].mxu0  ;;  %3157 = vmatmul.mubr.msk.f32.gmra.mrb[68].mxu1 %vm1449_vm2, %v1418_v5 }
 0x169   :  { %v1419_v22 = vmax.f32 %v1355_v21, 0.0  ;;  %v1195_v39 = vadd.f32 %v1194_v15, %v3867_v25 }
 0x16a   :  { %v1358_v40 = vadd.f32 %v3894_v37, %v1200_v14 }
 0x16b   :  { %v1357_v23 = vadd.f32 %v3894_v37, %v1195_v39  ;;  %v3055_v41 = vpop.f32.mrb[42].mxu0  ;;  %3159 = vmatprep.mubr.msk.f32.mxu1 %vm1449_vm2, %v1419_v22 }
 0x16c   :  { %v1422_v43 = vmax.f32 %v1358_v40, 0.0  ;;  %v1210_v45 = vadd.f32 %v3055_v41, %v3869_v26  ;;  %v1204_v46 = vpop.f32.mrb[43].mxu0  ;;  %3160 = vmatmul.mubr.msk.f32.gmra.mrb[70].mxu1 %vm1449_vm2, %v1420_v13 }
 0x16d   :  { %v1421_v24 = vmax.f32 %v1357_v23, 0.0  ;;  %v1205_v47 = vadd.f32 %v1204_v46, %v3871_v27 }
 0x16e   :  { %v1360_v48 = vadd.f32 %v3894_v37, %v1210_v45 }
 0x16f   :  { %v1359_v25 = vadd.f32 %v3894_v37, %v1205_v47  ;;  %v3058_v49 = vpop.f32.mrb[44].mxu0  ;;  %3162 = vmatprep.mubr.msk.f32.mxu1 %vm1449_vm2, %v1421_v24 }
 0x170   :  { %v1424_v51 = vmax.f32 %v1360_v48, 0.0  ;;  %v1220_v53 = vadd.f32 %v3058_v49, %v3873_v28  ;;  %v1214_v54 = vpop.f32.mrb[45].mxu0  ;;  %3163 = vmatmul.mubr.msk.f32.gmra.mrb[72].mxu1 %vm1449_vm2, %v1422_v43 }
 0x171   :  { %v1423_v26 = vmax.f32 %v1359_v25, 0.0  ;;  %v1215_v55 = vadd.f32 %v1214_v54, %v3875_v29 }
 0x172   :  { %v1362_v56 = vadd.f32 %v3894_v37, %v1220_v53 }
 0x173   :  { %v1361_v27 = vadd.f32 %v3894_v37, %v1215_v55  ;;  %v3061_v57 = vpop.f32.mrb[46].mxu0  ;;  %3165 = vmatprep.mubr.msk.f32.mxu1 %vm1449_vm2, %v1423_v26 }
 0x174   :  { %v1426_v16 = vmax.f32 %v1362_v56, 0.0  ;;  %v1230_v17 = vadd.f32 %v3061_v57, %v3877_v30  ;;  %v1224_v59 = vpop.f32.mrb[47].mxu0  ;;  %3166 = vmatmul.mubr.msk.f32.gmra.mrb[74].mxu1 %vm1449_vm2, %v1424_v51 }
 0x175   :  { %v1425_v28 = vmax.f32 %v1361_v27, 0.0  ;;  %v1225_v61 = vadd.f32 %v1224_v59, %v3879_v31 }
 0x176   :  { %v1364_v62 = vadd.f32 %v3894_v37, %v1230_v17 }
 0x177   :  { %v1363_v29 = vadd.f32 %v3894_v37, %v1225_v61  ;;  %v3064_v63 = vpop.f32.mrb[48].mxu0  ;;  %3168 = vmatprep.mubr.msk.f32.mxu1 %vm1449_vm2, %v1425_v28 }
 0x178   :  { %v1428_v0 = vmax.f32 %v1364_v62, 0.0  ;;  %v1240_v18 = vadd.f32 %v3064_v63, %v3881_v32  ;;  %v1234_v1 = vpop.f32.mrb[49].mxu0  ;;  %3169 = vmatmul.mubr.msk.f32.gmra.mrb[76].mxu1 %vm1449_vm2, %v1426_v16 }
 0x179   :  { %v1427_v30 = vmax.f32 %v1363_v29, 0.0  ;;  %v1235_v19 = vadd.f32 %v1234_v1, %v3883_v33 }
 0x17a   :  { %v1366_v3 = vadd.f32 %v3894_v37, %v1240_v18 }
 0x17b   :  { %v1365_v31 = vadd.f32 %v3894_v37, %v1235_v19  ;;  %v3067_v5 = vpop.f32.mrb[50].mxu0  ;;  %3171 = vmatprep.mubr.msk.f32.mxu1 %vm1449_vm2, %v1427_v30 }
 0x17c   :  { %v1430_v6 = vmax.f32 %v1366_v3, 0.0  ;;  %v1250_v7 = vadd.f32 %v3067_v5, %v3885_v34  ;;  %v1244_v20 = vpop.f32.mrb[51].mxu0  ;;  %3172 = vmatmul.mubr.msk.f32.gmra.mrb[78].mxu1 %vm1449_vm2, %v1428_v0 }
 0x17d   :  { %v1429_v32 = vmax.f32 %v1365_v31, 0.0  ;;  %v1245_v8 = vadd.f32 %v1244_v20, %v3887_v35  ;;  %v4088_v31 = vld [vmem:[%s4605_s2 + $0x68] ss:$0 sm:$0xff] }
 0x17e   :  { %v1368_v9 = vadd.f32 %v3894_v37, %v1250_v7 }
 0x17f   :  { %v1367_v33 = vadd.f32 %v3894_v37, %v1245_v8  ;;  %v3070_v21 = vpop.f32.mrb[52].mxu0  ;;  %3174 = vmatprep.mubr.msk.f32.mxu1 %vm1449_vm2, %v1429_v32 }
 0x180   :  { %v1432_v11 = vmax.f32 %v1368_v9, 0.0  ;;  %v1260_v13 = vadd.f32 %v3070_v21, %v3889_v36  ;;  %v1254_v14 = vpop.f32.mrb[53].mxu0  ;;  %3175 = vmatmul.mubr.msk.f32.gmra.mrb[80].mxu1 %vm1449_vm2, %v1430_v6 }
 0x181   :  { %v1431_v34 = vmax.f32 %v1367_v33, 0.0  ;;  %v1255_v15 = vadd.f32 %v1254_v14, %v3896_v38 }
 0x182   :  { %v1370_v22 = vadd.f32 %v3894_v37, %v1260_v13 }
 0x183   :  { %v1369_v35 = vadd.f32 %v3894_v37, %v1255_v15  ;;  %v3073_v39 = vpop.f32.mrb[54].mxu0  ;;  %3177 = vmatprep.mubr.msk.f32.mxu1 %vm1449_vm2, %v1431_v34 }
 0x184   :  { %v1434_v40 = vmax.f32 %v1370_v22, 0.0  ;;  %v1270_v23 = vadd.f32 %v3073_v39, %v3899_v42  ;;  %v1264_v41 = vpop.f32.mrb[55].mxu0  ;;  %3178 = vmatmul.mubr.msk.f32.gmra.mrb[82].mxu1 %vm1449_vm2, %v1432_v11 }
 0x185   :  { %v1433_v36 = vmax.f32 %v1369_v35, 0.0  ;;  %v1265_v43 = vadd.f32 %v1264_v41, %v3902_v44 }
 0x186   :  { %v1372_v45 = vadd.f32 %v3894_v37, %v1270_v23 }
 0x187   :  { %v1371_v38 = vadd.f32 %v3894_v37, %v1265_v43  ;;  %v3076_v46 = vpop.f32.mrb[56].mxu0  ;;  %3180 = vmatprep.mubr.msk.f32.mxu1 %vm1449_vm2, %v1433_v36 }
 0x188   :  { %v1436_v24 = vmax.f32 %v1372_v45, 0.0  ;;  %v1280_v47 = vadd.f32 %v3076_v46, %v3905_v50  ;;  %v1274_v48 = vpop.f32.mrb[57].mxu0  ;;  %3181 = vmatmul.mubr.msk.f32.gmra.mrb[84].mxu1 %vm1449_vm2, %v1434_v40 }
 0x189   :  { %v1435_v42 = vmax.f32 %v1371_v38, 0.0  ;;  %v1275_v25 = vadd.f32 %v1274_v48, %v3909_v52 }
 0x18a   :  { %v1374_v49 = vadd.f32 %v3894_v37, %v1280_v47 }
 0x18b   :  { %v1373_v44 = vadd.f32 %v3894_v37, %v1275_v25  ;;  %v3079_v51 = vpop.f32.mrb[58].mxu0  ;;  %3183 = vmatprep.mubr.msk.f32.mxu1 %vm1449_vm2, %v1435_v42 }
 0x18c   :  { %v1438_v53 = vmax.f32 %v1374_v49, 0.0  ;;  %v1290_v54 = vadd.f32 %v3079_v51, %v3913_v58  ;;  %v1284_v26 = vpop.f32.mrb[59].mxu0  ;;  %3184 = vmatmul.mubr.msk.f32.gmra.mrb[86].mxu1 %vm1449_vm2, %v1436_v24 }
 0x18d   :  { %v1437_v50 = vmax.f32 %v1373_v44, 0.0  ;;  %v1285_v55 = vadd.f32 %v1284_v26, %v3917_v60 }
 0x18e   :  { %v1376_v56 = vadd.f32 %v3894_v37, %v1290_v54 }
 0x18f   :  { %v1375_v52 = vadd.f32 %v3894_v37, %v1285_v55  ;;  %v3082_v27 = vpop.f32.mrb[60].mxu0  ;;  %3186 = vmatprep.mubr.msk.f32.mxu1 %vm1449_vm2, %v1437_v50 }
 0x190   :  { %v1440_v57 = vmax.f32 %v1376_v56, 0.0  ;;  %v1300_v16 = vadd.f32 %v3082_v27, %v3921_v2  ;;  %v1294_v17 = vpop.f32.mrb[61].mxu0  ;;  %3187 = vmatmul.mubr.msk.f32.gmra.mrb[88].mxu1 %vm1449_vm2, %v1438_v53 }
 0x191   :  { %v1439_v58 = vmax.f32 %v1375_v52, 0.0  ;;  %v1295_v59 = vadd.f32 %v1294_v17, %v3925_v4 }
 0x192   :  { %v1378_v28 = vadd.f32 %v3894_v37, %v1300_v16 }
 0x193   :  { %v1377_v60 = vadd.f32 %v3894_v37, %v1295_v59  ;;  %v3085_v61 = vpop.f32.mrb[62].mxu0  ;;  %3189 = vmatprep.mubr.msk.f32.mxu1 %vm1449_vm2, %v1439_v58 }
 0x194   :  { %v1442_v62 = vmax.f32 %v1378_v28, 0.0  ;;  %v1310_v29 = vadd.f32 %v3085_v61, %v3929_v10  ;;  %v1304_v63 = vpop.f32.mrb[63].mxu0  ;;  %3190 = vmatmul.mubr.msk.f32.gmra.mrb[90].mxu1 %vm1449_vm2, %v1440_v57  ;;  %v4081_v10 = vld [vmem:[%s4605_s2 + $0x60] ss:$0 sm:$0xff] }
 0x195   :  { %v1441_v2 = vmax.f32 %v1377_v60, 0.0  ;;  %v1305_v0 = vadd.f32 %v1304_v63, %v3933_v12 }
 0x196   :  { %v1380_v18 = vadd.f32 %v3894_v37, %v1310_v29 }
 0x197   :  { %v1379_v4 = vadd.f32 %v3894_v37, %v1305_v0  ;;  %3192 = vmatprep.mubr.msk.f32.mxu1 %vm1449_vm2, %v1441_v2 }
 0x198   :  { %v1444_v1 = vmax.f32 %v1380_v18, 0.0  ;;  %3193 = vmatmul.mubr.msk.f32.gmra.mrb[92].mxu1 %vm1449_vm2, %v1442_v62 }
 0x199   :  { %v1443_v30 = vmax.f32 %v1379_v4, 0.0 }
 0x19b   :  { %3195 = vmatprep.mubr.msk.f32.mxu1 %vm1449_vm2, %v1443_v30 }
 0x19c   :  { %3196 = vmatmul.mubr.msk.f32.gmra.mrb[94].mxu1 %vm1449_vm2, %v1444_v1 }
 0x1f1   :  { %v3104_v12 = vpop.f32.mrb[32].mxu1 }
 0x1f2   :  { %v1714_v19 = vadd.f32 %v3104_v12, %v4081_v10  ;;  %v1708_v3 = vpop.f32.mrb[33].mxu1 }
 0x1f3   :  { %v1709_v37 = vadd.f32 %v4081_v10, %v1708_v3 }
 0x1f4   :  { %v2028_v5 = vmax.f32 %v1714_v19, 0.0 }
 0x1f5   :  { %v2027_v6 = vmax.f32 %v1709_v37, 0.0  ;;  %v3107_v7 = vpop.f32.mrb[34].mxu1 }
 0x1f6   :  { %v1724_v20 = vadd.f32 %v3107_v7, %v4081_v10  ;;  %v1718_v32 = vpop.f32.mrb[35].mxu1  ;;  %v2096_v8 = vmul.f32 %v4088_v31, %v2028_v5 }
 0x1f7   :  { %v1719_v9 = vadd.f32 %v4081_v10, %v1718_v32  ;;  %v2095_v11 = vmul.f32 %v4088_v31, %v2027_v6 }
 0x1f8   :  { %v2030_v33 = vmax.f32 %v1724_v20, 0.0  ;;  %v2163_v21 = vsel %vm2159_vm3, %v2096_v8, 0.0 }
 0x1f9   :  { %v2029_v13 = vmax.f32 %v1719_v9, 0.0  ;;  %2164 = vadd.xlane.f32.xlu0 %v2163_v21  ;;  %v3110_v14 = vpop.f32.mrb[36].mxu1  ;;  %v2160_v40 = vsel %vm2159_vm3, %v2095_v11, 0.0 }
 0x1fa   :  { %v1734_v34 = vadd.f32 %v3110_v14, %v4081_v10  ;;  %v1728_v15 = vpop.f32.mrb[37].mxu1  ;;  %v2098_v22 = vmul.f32 %v4088_v31, %v2030_v33 }
 0x1fb   :  { %v1729_v35 = vadd.f32 %v4081_v10, %v1728_v15  ;;  %v2097_v41 = vmul.f32 %v4088_v31, %v2029_v13 }
 0x1fc   :  { %v2032_v39 = vmax.f32 %v1734_v34, 0.0  ;;  %v2169_v23 = vsel %vm2159_vm3, %v2098_v22, 0.0 }
 0x1fd   :  { %v2031_v36 = vmax.f32 %v1729_v35, 0.0  ;;  %2161 = vadd.xlane.f32.xlu0 %v2160_v40  ;;  %2170 = vadd.xlane.f32.xlu1 %v2169_v23  ;;  %v3113_v43 = vpop.f32.mrb[38].mxu1  ;;  %v2166_v48 = vsel %vm2159_vm3, %v2097_v41, 0.0 }
 0x1fe   :  { %v1744_v45 = vadd.f32 %v3113_v43, %v4081_v10  ;;  %v1738_v38 = vpop.f32.mrb[39].mxu1  ;;  %v2100_v42 = vmul.f32 %v4088_v31, %v2032_v39 }
 0x1ff   :  { %v1739_v46 = vadd.f32 %v4081_v10, %v1738_v38  ;;  %v2099_v24 = vmul.f32 %v4088_v31, %v2031_v36 }
 0x200   :  { %v2034_v47 = vmax.f32 %v1744_v45, 0.0  ;;  %v2175_v55 = vsel %vm2159_vm3, %v2100_v42, 0.0 }
 0x201   :  { %v2033_v25 = vmax.f32 %v1739_v46, 0.0  ;;  %2167 = vadd.xlane.f32.xlu1 %v2166_v48  ;;  %v3116_v49 = vpop.f32.mrb[40].mxu1  ;;  %v2172_v44 = vsel %vm2159_vm3, %v2099_v24, 0.0 }
 0x202   :  { %v1754_v51 = vadd.f32 %v3116_v49, %v4081_v10  ;;  %2173 = vadd.xlane.f32.xlu0 %v2172_v44  ;;  %v1748_v53 = vpop.f32.mrb[41].mxu1  ;;  %v2102_v56 = vmul.f32 %v4088_v31, %v2034_v47 }
 0x203   :  { %v1749_v54 = vadd.f32 %v4081_v10, %v1748_v53  ;;  %v2101_v26 = vmul.f32 %v4088_v31, %v2033_v25 }
 0x204   :  { %v2036_v50 = vmax.f32 %v1754_v51, 0.0  ;;  %v2181_v60 = vsel %vm2159_vm3, %v2102_v56, 0.0 }
 0x205   :  { %v2035_v52 = vmax.f32 %v1749_v54, 0.0  ;;  %2176 = vadd.xlane.f32.xlu1 %v2175_v55  ;;  %v3119_v27 = vpop.f32.mrb[42].mxu1  ;;  %v2178_v57 = vsel %vm2159_vm3, %v2101_v26, 0.0 }
 0x206   :  { %v1764_v16 = vadd.f32 %v3119_v27, %v4081_v10  ;;  %2179 = vadd.xlane.f32.xlu0 %v2178_v57  ;;  %v1758_v17 = vpop.f32.mrb[43].mxu1  ;;  %v2104_v61 = vmul.f32 %v4088_v31, %v2036_v50 }
 0x207   :  { %v1759_v58 = vadd.f32 %v4081_v10, %v1758_v17  ;;  %v2103_v59 = vmul.f32 %v4088_v31, %v2035_v52 }
 0x208   :  { %v2038_v28 = vmax.f32 %v1764_v16, 0.0  ;;  %v2187_v30 = vsel %vm2159_vm3, %v2104_v61, 0.0 }
 0x209   :  { %v2037_v62 = vmax.f32 %v1759_v58, 0.0  ;;  %2182 = vadd.xlane.f32.xlu1 %v2181_v60  ;;  %v3122_v29 = vpop.f32.mrb[44].mxu1  ;;  %v2184_v63 = vsel %vm2159_vm3, %v2103_v59, 0.0 }
 0x20a   :  { %v1774_v2 = vadd.f32 %v3122_v29, %v4081_v10  ;;  %2185 = vadd.xlane.f32.xlu0 %v2184_v63  ;;  %v1768_v0 = vpop.f32.mrb[45].mxu1  ;;  %v2106_v12 = vmul.f32 %v4088_v31, %v2038_v28 }
 0x20b   :  { %v1769_v18 = vadd.f32 %v4081_v10, %v1768_v0  ;;  %v2105_v4 = vmul.f32 %v4088_v31, %v2037_v62 }
 0x20c   :  { %v2040_v1 = vmax.f32 %v1774_v2, 0.0  ;;  %v2193_v8 = vsel %vm2159_vm3, %v2106_v12, 0.0 }
 0x20d   :  { %v2039_v19 = vmax.f32 %v1769_v18, 0.0  ;;  %2188 = vadd.xlane.f32.xlu1 %v2187_v30  ;;  %v3125_v3 = vpop.f32.mrb[46].mxu1  ;;  %v2190_v37 = vsel %vm2159_vm3, %v2105_v4, 0.0 }
 0x20e   :  { %v1784_v5 = vadd.f32 %v3125_v3, %v4081_v10  ;;  %2191 = vadd.xlane.f32.xlu0 %v2190_v37  ;;  %v1778_v6 = vpop.f32.mrb[47].mxu1  ;;  %v2108_v9 = vmul.f32 %v4088_v31, %v2040_v1 }
 0x20f   :  { %v1779_v7 = vadd.f32 %v4081_v10, %v1778_v6  ;;  %v2107_v20 = vmul.f32 %v4088_v31, %v2039_v19 }
 0x210   :  { %v2042_v32 = vmax.f32 %v1784_v5, 0.0  ;;  %v2199_v35 = vsel %vm2159_vm3, %v2108_v9, 0.0 }
 0x211   :  { %v2041_v33 = vmax.f32 %v1779_v7, 0.0  ;;  %2194 = vadd.xlane.f32.xlu1 %v2193_v8  ;;  %v3128_v21 = vpop.f32.mrb[48].mxu1  ;;  %v2196_v11 = vsel %vm2159_vm3, %v2107_v20, 0.0 }
 0x212   :  { %v1794_v13 = vadd.f32 %v3128_v21, %v4081_v10  ;;  %2197 = vadd.xlane.f32.xlu0 %v2196_v11  ;;  %v1788_v14 = vpop.f32.mrb[49].mxu1  ;;  %v2110_v39 = vmul.f32 %v4088_v31, %v2042_v32 }
 0x213   :  { %v1789_v34 = vadd.f32 %v4081_v10, %v1788_v14  ;;  %v2109_v15 = vmul.f32 %v4088_v31, %v2041_v33 }
 0x214   :  { %v2044_v22 = vmax.f32 %v1794_v13, 0.0  ;;  %v2205_v24 = vsel %vm2159_vm3, %v2110_v39, 0.0 }
 0x215   :  { %v2043_v40 = vmax.f32 %v1789_v34, 0.0  ;;  %2200 = vadd.xlane.f32.xlu1 %v2199_v35  ;;  %v3131_v23 = vpop.f32.mrb[50].mxu1  ;;  %v2202_v41 = vsel %vm2159_vm3, %v2109_v15, 0.0 }
 0x216   :  { %v1804_v36 = vadd.f32 %v3131_v23, %v4081_v10  ;;  %2203 = vadd.xlane.f32.xlu0 %v2202_v41  ;;  %v1798_v43 = vpop.f32.mrb[51].mxu1  ;;  %v2112_v47 = vmul.f32 %v4088_v31, %v2044_v22 }
 0x217   :  { %v1799_v45 = vadd.f32 %v4081_v10, %v1798_v43  ;;  %v2111_v38 = vmul.f32 %v4088_v31, %v2043_v40 }
 0x218   :  { %v2046_v46 = vmax.f32 %v1804_v36, 0.0  ;;  %v2211_v26 = vsel %vm2159_vm3, %v2112_v47, 0.0 }
 0x219   :  { %v2045_v48 = vmax.f32 %v1799_v45, 0.0  ;;  %2206 = vadd.xlane.f32.xlu1 %v2205_v24  ;;  %v3134_v42 = vpop.f32.mrb[52].mxu1  ;;  %v2208_v25 = vsel %vm2159_vm3, %v2111_v38, 0.0 }
 0x21a   :  { %v1814_v49 = vadd.f32 %v3134_v42, %v4081_v10  ;;  %2209 = vadd.xlane.f32.xlu0 %v2208_v25  ;;  %v1808_v44 = vpop.f32.mrb[53].mxu1  ;;  %v2114_v50 = vmul.f32 %v4088_v31, %v2046_v46 }
 0x21b   :  { %v1809_v51 = vadd.f32 %v4081_v10, %v1808_v44  ;;  %v2113_v53 = vmul.f32 %v4088_v31, %v2045_v48 }
 0x21c   :  { %v2048_v54 = vmax.f32 %v1814_v49, 0.0  ;;  %v2217_v59 = vsel %vm2159_vm3, %v2114_v50, 0.0 }
 0x21d   :  { %v2047_v55 = vmax.f32 %v1809_v51, 0.0  ;;  %2212 = vadd.xlane.f32.xlu1 %v2211_v26  ;;  %v3137_v56 = vpop.f32.mrb[54].mxu1  ;;  %v2214_v52 = vsel %vm2159_vm3, %v2113_v53, 0.0 }
 0x21e   :  { %v1824_v27 = vadd.f32 %v3137_v56, %v4081_v10  ;;  %2215 = vadd.xlane.f32.xlu0 %v2214_v52  ;;  %v1818_v57 = vpop.f32.mrb[55].mxu1  ;;  %v2116_v28 = vmul.f32 %v4088_v31, %v2048_v54 }
 0x21f   :  { %v1819_v16 = vadd.f32 %v4081_v10, %v1818_v57  ;;  %v2115_v17 = vmul.f32 %v4088_v31, %v2047_v55 }
 0x220   :  { %v2050_v58 = vmax.f32 %v1824_v27, 0.0  ;;  %v2223_v4 = vsel %vm2159_vm3, %v2116_v28, 0.0 }
 0x221   :  { %v2049_v60 = vmax.f32 %v1819_v16, 0.0  ;;  %2218 = vadd.xlane.f32.xlu1 %v2217_v59  ;;  %v3140_v61 = vpop.f32.mrb[56].mxu1  ;;  %v2220_v62 = vsel %vm2159_vm3, %v2115_v17, 0.0 }
 0x222   :  { %v1834_v29 = vadd.f32 %v3140_v61, %v4081_v10  ;;  %2221 = vadd.xlane.f32.xlu0 %v2220_v62  ;;  %v1828_v63 = vpop.f32.mrb[57].mxu1  ;;  %v2118_v1 = vmul.f32 %v4088_v31, %v2050_v58 }
 0x223   :  { %v1829_v2 = vadd.f32 %v4081_v10, %v1828_v63  ;;  %v2117_v0 = vmul.f32 %v4088_v31, %v2049_v60 }
 0x224   :  { %v2052_v18 = vmax.f32 %v1834_v29, 0.0  ;;  %v2229_v20 = vsel %vm2159_vm3, %v2118_v1, 0.0 }
 0x225   :  { %v2051_v30 = vmax.f32 %v1829_v2, 0.0  ;;  %2224 = vadd.xlane.f32.xlu1 %v2223_v4  ;;  %v3143_v12 = vpop.f32.mrb[58].mxu1  ;;  %v2226_v19 = vsel %vm2159_vm3, %v2117_v0, 0.0 }
 0x226   :  { %v1844_v3 = vadd.f32 %v3143_v12, %v4081_v10  ;;  %2227 = vadd.xlane.f32.xlu0 %v2226_v19  ;;  %v1838_v37 = vpop.f32.mrb[59].mxu1  ;;  %v2120_v32 = vmul.f32 %v4088_v31, %v2052_v18 }
 0x227   :  { %v1839_v5 = vadd.f32 %v4081_v10, %v1838_v37  ;;  %v2119_v6 = vmul.f32 %v4088_v31, %v2051_v30 }
 0x228   :  { %v2054_v7 = vmax.f32 %v1844_v3, 0.0  ;;  %v2235_v15 = vsel %vm2159_vm3, %v2120_v32, 0.0 }
 0x229   :  { %v2053_v8 = vmax.f32 %v1839_v5, 0.0  ;;  %2230 = vadd.xlane.f32.xlu1 %v2229_v20  ;;  %v3146_v9 = vpop.f32.mrb[60].mxu1  ;;  %v2232_v33 = vsel %vm2159_vm3, %v2119_v6, 0.0 }
 0x22a   :  { %v1854_v21 = vadd.f32 %v3146_v9, %v4081_v10  ;;  %2233 = vadd.xlane.f32.xlu0 %v2232_v33  ;;  %v1848_v11 = vpop.f32.mrb[61].mxu1  ;;  %v2122_v22 = vmul.f32 %v4088_v31, %v2054_v7 }
 0x22b   :  { %v1849_v13 = vadd.f32 %v4081_v10, %v1848_v11  ;;  %v2121_v14 = vmul.f32 %v4088_v31, %v2053_v8 }
 0x22c   :  { %v2056_v34 = vmax.f32 %v1854_v21, 0.0  ;;  %v2241_v38 = vsel %vm2159_vm3, %v2122_v22, 0.0 }
 0x22d   :  { %v2055_v35 = vmax.f32 %v1849_v13, 0.0  ;;  %2236 = vadd.xlane.f32.xlu1 %v2235_v15  ;;  %v3149_v39 = vpop.f32.mrb[62].mxu1  ;;  %v2238_v40 = vsel %vm2159_vm3, %v2121_v14, 0.0 }
 0x22e   :  { %v1864_v23 = vadd.f32 %v3149_v39, %v4081_v10  ;;  %2239 = vadd.xlane.f32.xlu0 %v2238_v40  ;;  %v1858_v41 = vpop.f32.mrb[63].mxu1  ;;  %v2124_v46 = vmul.f32 %v4088_v31, %v2056_v34 }
 0x22f   :  { %v1859_v36 = vadd.f32 %v4081_v10, %v1858_v41  ;;  %v2123_v43 = vmul.f32 %v4088_v31, %v2055_v35 }
 0x230   :  { %v2058_v45 = vmax.f32 %v1864_v23, 0.0  ;;  %v2247_v44 = vsel %vm2159_vm3, %v2124_v46, 0.0 }
 0x231   :  { %v2057_v24 = vmax.f32 %v1859_v36, 0.0  ;;  %2242 = vadd.xlane.f32.xlu1 %v2241_v38  ;;  %v2244_v47 = vsel %vm2159_vm3, %v2123_v43, 0.0 }
 0x232   :  { %2245 = vadd.xlane.f32.xlu0 %v2244_v47  ;;  %v2126_v51 = vmul.f32 %v4088_v31, %v2058_v45 }
 0x233   :  { %v3152_v48 = vpop.f32.mrb[64].mxu1  ;;  %v2125_v42 = vmul.f32 %v4088_v31, %v2057_v24 }
 0x234   :  { %v1874_v25 = vadd.f32 %v3152_v48, %v4081_v10  ;;  %v1868_v49 = vpop.f32.mrb[65].mxu1  ;;  %v2253_v27 = vsel %vm2159_vm3, %v2126_v51, 0.0 }
 0x235   :  { %v1869_v53 = vadd.f32 %v4081_v10, %v1868_v49  ;;  %2248 = vadd.xlane.f32.xlu1 %v2247_v44  ;;  %v2250_v54 = vsel %vm2159_vm3, %v2125_v42, 0.0 }
 0x236   :  { %v2060_v26 = vmax.f32 %v1874_v25, 0.0  ;;  %2251 = vadd.xlane.f32.xlu0 %v2250_v54 }
 0x237   :  { %v2059_v50 = vmax.f32 %v1869_v53, 0.0  ;;  %v3155_v55 = vpop.f32.mrb[66].mxu1 }
 0x238   :  { %v1884_v56 = vadd.f32 %v3155_v55, %v4081_v10  ;;  %v1878_v52 = vpop.f32.mrb[67].mxu1  ;;  %v2128_v57 = vmul.f32 %v4088_v31, %v2060_v26 }
 0x239   :  { %v1879_v16 = vadd.f32 %v4081_v10, %v1878_v52  ;;  %2254 = vadd.xlane.f32.xlu1 %v2253_v27  ;;  %v2127_v17 = vmul.f32 %v4088_v31, %v2059_v50 }
 0x23a   :  { %v2062_v58 = vmax.f32 %v1884_v56, 0.0  ;;  %v2259_v29 = vsel %vm2159_vm3, %v2128_v57, 0.0 }
 0x23b   :  { %v2061_v59 = vmax.f32 %v1879_v16, 0.0  ;;  %v3158_v28 = vpop.f32.mrb[68].mxu1  ;;  %v2256_v60 = vsel %vm2159_vm3, %v2127_v17, 0.0 }
 0x23c   :  { %v1894_v61 = vadd.f32 %v3158_v28, %v4081_v10  ;;  %v1888_v62 = vpop.f32.mrb[69].mxu1  ;;  %2257 = vadd.xlane.f32.xlu0 %v2256_v60  ;;  %v2130_v63 = vmul.f32 %v4088_v31, %v2062_v58 }
 0x23d   :  { %v1889_v2 = vadd.f32 %v4081_v10, %v1888_v62  ;;  %2260 = vadd.xlane.f32.xlu1 %v2259_v29  ;;  %v2129_v0 = vmul.f32 %v4088_v31, %v2061_v59 }
 0x23e   :  { %v2064_v18 = vmax.f32 %v1894_v61, 0.0  ;;  %v2265_v3 = vsel %vm2159_vm3, %v2130_v63, 0.0 }
 0x23f   :  { %v2063_v4 = vmax.f32 %v1889_v2, 0.0  ;;  %v3161_v1 = vpop.f32.mrb[70].mxu1  ;;  %v2262_v30 = vsel %vm2159_vm3, %v2129_v0, 0.0 }
 0x240   :  { %v1904_v12 = vadd.f32 %v3161_v1, %v4081_v10  ;;  %v1898_v19 = vpop.f32.mrb[71].mxu1  ;;  %2263 = vadd.xlane.f32.xlu0 %v2262_v30  ;;  %v2132_v37 = vmul.f32 %v4088_v31, %v2064_v18 }
 0x241   :  { %v1899_v5 = vadd.f32 %v4081_v10, %v1898_v19  ;;  %2266 = vadd.xlane.f32.xlu1 %v2265_v3  ;;  %v2131_v6 = vmul.f32 %v4088_v31, %v2063_v4 }
 0x242   :  { %v2066_v7 = vmax.f32 %v1904_v12, 0.0  ;;  %v2271_v21 = vsel %vm2159_vm3, %v2132_v37, 0.0 }
 0x243   :  { %v2065_v20 = vmax.f32 %v1899_v5, 0.0  ;;  %v3164_v32 = vpop.f32.mrb[72].mxu1  ;;  %v2268_v8 = vsel %vm2159_vm3, %v2131_v6, 0.0 }
 0x244   :  { %v1914_v9 = vadd.f32 %v3164_v32, %v4081_v10  ;;  %v1908_v33 = vpop.f32.mrb[73].mxu1  ;;  %2269 = vadd.xlane.f32.xlu0 %v2268_v8  ;;  %v2134_v11 = vmul.f32 %v4088_v31, %v2066_v7 }
 0x245   :  { %v1909_v13 = vadd.f32 %v4081_v10, %v1908_v33  ;;  %2272 = vadd.xlane.f32.xlu1 %v2271_v21  ;;  %v2133_v14 = vmul.f32 %v4088_v31, %v2065_v20 }
 0x246   :  { %v2068_v34 = vmax.f32 %v1914_v9, 0.0  ;;  %v2277_v23 = vsel %vm2159_vm3, %v2134_v11, 0.0 }
 0x247   :  { %v2067_v15 = vmax.f32 %v1909_v13, 0.0  ;;  %v3167_v22 = vpop.f32.mrb[74].mxu1  ;;  %v2274_v35 = vsel %vm2159_vm3, %v2133_v14, 0.0 }
 0x248   :  { %v1924_v39 = vadd.f32 %v3167_v22, %v4081_v10  ;;  %v1918_v40 = vpop.f32.mrb[75].mxu1  ;;  %2275 = vadd.xlane.f32.xlu0 %v2274_v35  ;;  %v2136_v41 = vmul.f32 %v4088_v31, %v2068_v34 }
 0x249   :  { %v1919_v36 = vadd.f32 %v4081_v10, %v1918_v40  ;;  %2278 = vadd.xlane.f32.xlu1 %v2277_v23  ;;  %v2135_v43 = vmul.f32 %v4088_v31, %v2067_v15 }
 0x24a   :  { %v2070_v45 = vmax.f32 %v1924_v39, 0.0  ;;  %v2283_v42 = vsel %vm2159_vm3, %v2136_v41, 0.0 }
 0x24b   :  { %v2069_v38 = vmax.f32 %v1919_v36, 0.0  ;;  %v3170_v46 = vpop.f32.mrb[76].mxu1  ;;  %v2280_v24 = vsel %vm2159_vm3, %v2135_v43, 0.0 }
 0x24c   :  { %v1934_v47 = vadd.f32 %v3170_v46, %v4081_v10  ;;  %v1928_v48 = vpop.f32.mrb[77].mxu1  ;;  %2281 = vadd.xlane.f32.xlu0 %v2280_v24  ;;  %v2138_v25 = vmul.f32 %v4088_v31, %v2070_v45 }
 0x24d   :  { %v1929_v49 = vadd.f32 %v4081_v10, %v1928_v48  ;;  %2284 = vadd.xlane.f32.xlu1 %v2283_v42  ;;  %v2137_v44 = vmul.f32 %v4088_v31, %v2069_v38 }
 0x24e   :  { %v2072_v51 = vmax.f32 %v1934_v47, 0.0  ;;  %v2289_v56 = vsel %vm2159_vm3, %v2138_v25, 0.0 }
 0x24f   :  { %v2071_v53 = vmax.f32 %v1929_v49, 0.0  ;;  %v3173_v54 = vpop.f32.mrb[78].mxu1  ;;  %v2286_v26 = vsel %vm2159_vm3, %v2137_v44, 0.0 }
 0x250   :  { %v1944_v50 = vadd.f32 %v3173_v54, %v4081_v10  ;;  %v1938_v55 = vpop.f32.mrb[79].mxu1  ;;  %2287 = vadd.xlane.f32.xlu0 %v2286_v26  ;;  %v2140_v52 = vmul.f32 %v4088_v31, %v2072_v51 }
 0x251   :  { %v1939_v27 = vadd.f32 %v4081_v10, %v1938_v55  ;;  %2290 = vadd.xlane.f32.xlu1 %v2289_v56  ;;  %v2139_v57 = vmul.f32 %v4088_v31, %v2071_v53 }
 0x252   :  { %v2074_v16 = vmax.f32 %v1944_v50, 0.0  ;;  %v2295_v61 = vsel %vm2159_vm3, %v2140_v52, 0.0 }
 0x253   :  { %v2073_v17 = vmax.f32 %v1939_v27, 0.0  ;;  %v3176_v58 = vpop.f32.mrb[80].mxu1  ;;  %v2292_v59 = vsel %vm2159_vm3, %v2139_v57, 0.0 }
 0x254   :  { %v1954_v28 = vadd.f32 %v3176_v58, %v4081_v10  ;;  %v1948_v60 = vpop.f32.mrb[81].mxu1  ;;  %2293 = vadd.xlane.f32.xlu0 %v2292_v59  ;;  %v2142_v62 = vmul.f32 %v4088_v31, %v2074_v16 }
 0x255   :  { %v1949_v29 = vadd.f32 %v4081_v10, %v1948_v60  ;;  %2296 = vadd.xlane.f32.xlu1 %v2295_v61  ;;  %v2141_v63 = vmul.f32 %v4088_v31, %v2073_v17 }
 0x256   :  { %v2076_v2 = vmax.f32 %v1954_v28, 0.0  ;;  %v2301_v12 = vsel %vm2159_vm3, %v2142_v62, 0.0 }
 0x257   :  { %v2075_v0 = vmax.f32 %v1949_v29, 0.0  ;;  %v3179_v18 = vpop.f32.mrb[82].mxu1  ;;  %v2298_v4 = vsel %vm2159_vm3, %v2141_v63, 0.0 }
 0x258   :  { %v1964_v1 = vadd.f32 %v3179_v18, %v4081_v10  ;;  %v1958_v30 = vpop.f32.mrb[83].mxu1  ;;  %2299 = vadd.xlane.f32.xlu0 %v2298_v4  ;;  %v2144_v19 = vmul.f32 %v4088_v31, %v2076_v2 }
 0x259   :  { %v1959_v3 = vadd.f32 %v4081_v10, %v1958_v30  ;;  %2302 = vadd.xlane.f32.xlu1 %v2301_v12  ;;  %v2143_v37 = vmul.f32 %v4088_v31, %v2075_v0 }
 0x25a   :  { %v2078_v5 = vmax.f32 %v1964_v1, 0.0  ;;  %v2307_v9 = vsel %vm2159_vm3, %v2144_v19, 0.0 }
 0x25b   :  { %v2077_v6 = vmax.f32 %v1959_v3, 0.0  ;;  %v3182_v7 = vpop.f32.mrb[84].mxu1  ;;  %v2304_v20 = vsel %vm2159_vm3, %v2143_v37, 0.0 }
 0x25c   :  { %v1974_v32 = vadd.f32 %v3182_v7, %v4081_v10  ;;  %v1968_v8 = vpop.f32.mrb[85].mxu1  ;;  %2305 = vadd.xlane.f32.xlu0 %v2304_v20  ;;  %v2146_v33 = vmul.f32 %v4088_v31, %v2078_v5 }
 0x25d   :  { %v1969_v21 = vadd.f32 %v4081_v10, %v1968_v8  ;;  %2308 = vadd.xlane.f32.xlu1 %v2307_v9  ;;  %v2145_v11 = vmul.f32 %v4088_v31, %v2077_v6  ;;  %v4283_v8 = vld [vmem:[%s4605_s2 + $0x70] ss:$0 sm:$0xff] }
 0x25e   :  { %v2080_v13 = vmax.f32 %v1974_v32, 0.0  ;;  %v2313_v39 = vsel %vm2159_vm3, %v2146_v33, 0.0 }
 0x25f   :  { %v2079_v14 = vmax.f32 %v1969_v21, 0.0  ;;  %v3185_v34 = vpop.f32.mrb[86].mxu1  ;;  %v2310_v15 = vsel %vm2159_vm3, %v2145_v11, 0.0 }
 0x260   :  { %v1984_v22 = vadd.f32 %v3185_v34, %v4081_v10  ;;  %v1978_v35 = vpop.f32.mrb[87].mxu1  ;;  %2311 = vadd.xlane.f32.xlu0 %v2310_v15  ;;  %v2148_v40 = vmul.f32 %v4088_v31, %v2080_v13 }
 0x261   :  { %v1979_v23 = vadd.f32 %v4081_v10, %v1978_v35  ;;  %2314 = vadd.xlane.f32.xlu1 %v2313_v39  ;;  %v2147_v41 = vmul.f32 %v4088_v31, %v2079_v14 }
 0x262   :  { %v2082_v36 = vmax.f32 %v1984_v22, 0.0  ;;  %v2319_v47 = vsel %vm2159_vm3, %v2148_v40, 0.0 }
 0x263   :  { %v2081_v43 = vmax.f32 %v1979_v23, 0.0  ;;  %v3188_v45 = vpop.f32.mrb[88].mxu1  ;;  %v2316_v38 = vsel %vm2159_vm3, %v2147_v41, 0.0 }
 0x264   :  { %v1994_v46 = vadd.f32 %v3188_v45, %v4081_v10  ;;  %v1988_v24 = vpop.f32.mrb[89].mxu1  ;;  %2317 = vadd.xlane.f32.xlu0 %v2316_v38  ;;  %v2150_v48 = vmul.f32 %v4088_v31, %v2082_v36 }
 0x265   :  { %v1989_v42 = vadd.f32 %v4081_v10, %v1988_v24  ;;  %2320 = vadd.xlane.f32.xlu1 %v2319_v47  ;;  %v2149_v25 = vmul.f32 %v4088_v31, %v2081_v43 }
 0x266   :  { %v2084_v49 = vmax.f32 %v1994_v46, 0.0  ;;  %v2325_v50 = vsel %vm2159_vm3, %v2150_v48, 0.0 }
 0x267   :  { %v2083_v44 = vmax.f32 %v1989_v42, 0.0  ;;  %v3191_v51 = vpop.f32.mrb[90].mxu1  ;;  %v2322_v53 = vsel %vm2159_vm3, %v2149_v25, 0.0 }
 0x268   :  { %v2004_v54 = vadd.f32 %v3191_v51, %v4081_v10  ;;  %v1998_v26 = vpop.f32.mrb[91].mxu1  ;;  %2323 = vadd.xlane.f32.xlu0 %v2322_v53  ;;  %v2152_v55 = vmul.f32 %v4088_v31, %v2084_v49 }
 0x269   :  { %v1999_v56 = vadd.f32 %v4081_v10, %v1998_v26  ;;  %2326 = vadd.xlane.f32.xlu1 %v2325_v50  ;;  %v2151_v52 = vmul.f32 %v4088_v31, %v2083_v44 }
 0x26a   :  { %v2086_v27 = vmax.f32 %v2004_v54, 0.0  ;;  %v2331_v28 = vsel %vm2159_vm3, %v2152_v55, 0.0 }
 0x26b   :  { %v2085_v57 = vmax.f32 %v1999_v56, 0.0  ;;  %v3194_v16 = vpop.f32.mrb[92].mxu1  ;;  %v2328_v17 = vsel %vm2159_vm3, %v2151_v52, 0.0 }
 0x26c   :  { %v2014_v58 = vadd.f32 %v3194_v16, %v4081_v10  ;;  %v2008_v59 = vpop.f32.mrb[93].mxu1  ;;  %2329 = vadd.xlane.f32.xlu0 %v2328_v17  ;;  %v2154_v60 = vmul.f32 %v4088_v31, %v2086_v27 }
 0x26d   :  { %v2009_v61 = vadd.f32 %v4081_v10, %v2008_v59  ;;  %2332 = vadd.xlane.f32.xlu1 %v2331_v28  ;;  %v2153_v62 = vmul.f32 %v4088_v31, %v2085_v57 }
 0x26e   :  { %v2088_v29 = vmax.f32 %v2014_v58, 0.0  ;;  %v2337_v1 = vsel %vm2159_vm3, %v2154_v60, 0.0 }
 0x26f   :  { %v2087_v63 = vmax.f32 %v2009_v61, 0.0  ;;  %v3197_v2 = vpop.f32.mrb[94].mxu1  ;;  %v2334_v0 = vsel %vm2159_vm3, %v2153_v62, 0.0 }
 0x270   :  { %v2024_v18 = vadd.f32 %v3197_v2, %v4081_v10  ;;  %v2018_v4 = vpop.f32.mrb[95].mxu1  ;;  %2335 = vadd.xlane.f32.xlu0 %v2334_v0  ;;  %v2156_v30 = vmul.f32 %v4088_v31, %v2088_v29 }
 0x271   :  { %v2019_v12 = vadd.f32 %v4081_v10, %v2018_v4  ;;  %2338 = vadd.xlane.f32.xlu1 %v2337_v1  ;;  %v2155_v19 = vmul.f32 %v4088_v31, %v2087_v63 }
 0x272   :  { %v2090_v3 = vmax.f32 %v2024_v18, 0.0  ;;  %v2343_v6 = vsel %vm2159_vm3, %v2156_v30, 0.0 }
 0x273   :  { %v2089_v37 = vmax.f32 %v2019_v12, 0.0  ;;  %v2340_v5 = vsel %vm2159_vm3, %v2155_v19, 0.0 }
 0x274   :  { %2341 = vadd.xlane.f32.xlu0 %v2340_v5  ;;  %v2158_v7 = vmul.f32 %v4088_v31, %v2090_v3 }
 0x275   :  { %2344 = vadd.xlane.f32.xlu1 %v2343_v6  ;;  %v2157_v20 = vmul.f32 %v4088_v31, %v2089_v37 }
 0x276   :  { %v2349_v10 = vsel %vm2159_vm3, %v2158_v7, 0.0 }
 0x277   :  { %v2346_v32 = vsel %vm2159_vm3, %v2157_v20, 0.0 }
 0x278   :  { %2347 = vadd.xlane.f32.xlu0 %v2346_v32 }
 0x279   :  { %2350 = vadd.xlane.f32.xlu1 %v2349_v10 }
 0x286   :  { %v2165_v9 = vpop.xlane.xlu0 %2164 }
 0x287   :  { %v2357_v33 = vadd.f32 %v4283_v8, %v2165_v9 }
 0x289   :  { %2422 = vst.msk [vmem:[%s4608_s3 + $0x8] sm:$0xff] %vm2420_vm4, %v2357_v33 }
 0x28a   :  { %v2162_v31 = vpop.xlane.xlu0 %2161  ;;  %v2171_v21 = vpop.xlane.xlu1 %2170 }
 0x28b   :  { %v2356_v11 = vadd.f32 %v4283_v8, %v2162_v31  ;;  %v2359_v13 = vadd.f32 %v4283_v8, %v2171_v21 }
 0x28d   :  { %2421 = vst.msk [vmem:[%s4608_s3] sm:$0xff] %vm2420_vm4, %v2356_v11  ;;  %2424 = vst.msk [vmem:[%s4608_s3 + $0x18] sm:$0xff] %vm2420_vm4, %v2359_v13 }
 0x28e   :  { %v2168_v14 = vpop.xlane.xlu1 %2167 }
 0x28f   :  { %v2358_v34 = vadd.f32 %v4283_v8, %v2168_v14  ;;  %v2174_v15 = vpop.xlane.xlu0 %2173 }
 0x290   :  { %v2360_v22 = vadd.f32 %v4283_v8, %v2174_v15 }
 0x291   :  { %2423 = vst.msk [vmem:[%s4608_s3 + $0x10] sm:$0xff] %vm2420_vm4, %v2358_v34 }
 0x292   :  { %2425 = vst.msk [vmem:[%s4608_s3 + $0x20] sm:$0xff] %vm2420_vm4, %v2360_v22  ;;  %v2177_v35 = vpop.xlane.xlu1 %2176 }
 0x293   :  { %v2361_v39 = vadd.f32 %v4283_v8, %v2177_v35  ;;  %v2180_v40 = vpop.xlane.xlu0 %2179 }
 0x294   :  { %v2362_v23 = vadd.f32 %v4283_v8, %v2180_v40 }
 0x295   :  { %2426 = vst.msk [vmem:[%s4608_s3 + $0x28] sm:$0xff] %vm2420_vm4, %v2361_v39 }
 0x296   :  { %2427 = vst.msk [vmem:[%s4608_s3 + $0x30] sm:$0xff] %vm2420_vm4, %v2362_v23  ;;  %v2183_v41 = vpop.xlane.xlu1 %2182 }
 0x297   :  { %v2363_v36 = vadd.f32 %v4283_v8, %v2183_v41  ;;  %v2186_v43 = vpop.xlane.xlu0 %2185 }
 0x298   :  { %v2364_v45 = vadd.f32 %v4283_v8, %v2186_v43 }
 0x299   :  { %2428 = vst.msk [vmem:[%s4608_s3 + $0x38] sm:$0xff] %vm2420_vm4, %v2363_v36 }
 0x29a   :  { %2429 = vst.msk [vmem:[%s4608_s3 + $0x40] sm:$0xff] %vm2420_vm4, %v2364_v45  ;;  %v2189_v38 = vpop.xlane.xlu1 %2188 }
 0x29b   :  { %v2365_v46 = vadd.f32 %v4283_v8, %v2189_v38  ;;  %v2192_v24 = vpop.xlane.xlu0 %2191 }
 0x29c   :  { %v2366_v47 = vadd.f32 %v4283_v8, %v2192_v24 }
 0x29d   :  { %2430 = vst.msk [vmem:[%s4608_s3 + $0x48] sm:$0xff] %vm2420_vm4, %v2365_v46 }
 0x29e   :  { %2431 = vst.msk [vmem:[%s4608_s3 + $0x50] sm:$0xff] %vm2420_vm4, %v2366_v47  ;;  %v2195_v48 = vpop.xlane.xlu1 %2194 }
 0x29f   :  { %v2367_v42 = vadd.f32 %v4283_v8, %v2195_v48  ;;  %v2198_v25 = vpop.xlane.xlu0 %2197 }
 0x2a0   :  { %v2368_v49 = vadd.f32 %v4283_v8, %v2198_v25 }
 0x2a1   :  { %2432 = vst.msk [vmem:[%s4608_s3 + $0x58] sm:$0xff] %vm2420_vm4, %v2367_v42 }
 0x2a2   :  { %2433 = vst.msk [vmem:[%s4608_s3 + $0x60] sm:$0xff] %vm2420_vm4, %v2368_v49  ;;  %v2201_v44 = vpop.xlane.xlu1 %2200 }
 0x2a3   :  { %v2369_v51 = vadd.f32 %v4283_v8, %v2201_v44  ;;  %v2204_v53 = vpop.xlane.xlu0 %2203 }
 0x2a4   :  { %v2370_v54 = vadd.f32 %v4283_v8, %v2204_v53 }
 0x2a5   :  { %2434 = vst.msk [vmem:[%s4608_s3 + $0x68] sm:$0xff] %vm2420_vm4, %v2369_v51 }
 0x2a6   :  { %2435 = vst.msk [vmem:[%s4608_s3 + $0x70] sm:$0xff] %vm2420_vm4, %v2370_v54  ;;  %v2207_v26 = vpop.xlane.xlu1 %2206 }
 0x2a7   :  { %v2371_v50 = vadd.f32 %v4283_v8, %v2207_v26  ;;  %v2210_v55 = vpop.xlane.xlu0 %2209 }
 0x2a8   :  { %v2372_v56 = vadd.f32 %v4283_v8, %v2210_v55 }
 0x2a9   :  { %2436 = vst.msk [vmem:[%s4608_s3 + $0x78] sm:$0xff] %vm2420_vm4, %v2371_v50 }
 0x2aa   :  { %2437 = vst.msk [vmem:[%s4608_s3 + $0x80] sm:$0xff] %vm2420_vm4, %v2372_v56  ;;  %v2213_v52 = vpop.xlane.xlu1 %2212 }
 0x2ab   :  { %v2373_v27 = vadd.f32 %v4283_v8, %v2213_v52  ;;  %v2216_v57 = vpop.xlane.xlu0 %2215 }
 0x2ac   :  { %v2374_v16 = vadd.f32 %v4283_v8, %v2216_v57 }
 0x2ad   :  { %2438 = vst.msk [vmem:[%s4608_s3 + $0x88] sm:$0xff] %vm2420_vm4, %v2373_v27 }
 0x2ae   :  { %2439 = vst.msk [vmem:[%s4608_s3 + $0x90] sm:$0xff] %vm2420_vm4, %v2374_v16  ;;  %v2219_v17 = vpop.xlane.xlu1 %2218 }
 0x2af   :  { %v2375_v58 = vadd.f32 %v4283_v8, %v2219_v17  ;;  %v2222_v59 = vpop.xlane.xlu0 %2221 }
 0x2b0   :  { %v2376_v28 = vadd.f32 %v4283_v8, %v2222_v59 }
 0x2b1   :  { %2440 = vst.msk [vmem:[%s4608_s3 + $0x98] sm:$0xff] %vm2420_vm4, %v2375_v58 }
 0x2b2   :  { %2441 = vst.msk [vmem:[%s4608_s3 + $0xa0] sm:$0xff] %vm2420_vm4, %v2376_v28  ;;  %v2225_v60 = vpop.xlane.xlu1 %2224 }
 0x2b3   :  { %v2377_v61 = vadd.f32 %v4283_v8, %v2225_v60  ;;  %v2228_v62 = vpop.xlane.xlu0 %2227 }
 0x2b4   :  { %v2378_v29 = vadd.f32 %v4283_v8, %v2228_v62 }
 0x2b5   :  { %2442 = vst.msk [vmem:[%s4608_s3 + $0xa8] sm:$0xff] %vm2420_vm4, %v2377_v61 }
 0x2b6   :  { %2443 = vst.msk [vmem:[%s4608_s3 + $0xb0] sm:$0xff] %vm2420_vm4, %v2378_v29  ;;  %v2231_v63 = vpop.xlane.xlu1 %2230 }
 0x2b7   :  { %v2379_v2 = vadd.f32 %v4283_v8, %v2231_v63  ;;  %v2234_v0 = vpop.xlane.xlu0 %2233 }
 0x2b8   :  { %v2380_v18 = vadd.f32 %v4283_v8, %v2234_v0 }
 0x2b9   :  { %2444 = vst.msk [vmem:[%s4608_s3 + $0xb8] sm:$0xff] %vm2420_vm4, %v2379_v2 }
 0x2ba   :  { %2445 = vst.msk [vmem:[%s4608_s3 + $0xc0] sm:$0xff] %vm2420_vm4, %v2380_v18  ;;  %v2237_v4 = vpop.xlane.xlu1 %2236 }
 0x2bb   :  { %v2381_v1 = vadd.f32 %v4283_v8, %v2237_v4  ;;  %v2240_v30 = vpop.xlane.xlu0 %2239 }
 0x2bc   :  { %v2382_v12 = vadd.f32 %v4283_v8, %v2240_v30 }
 0x2bd   :  { %2446 = vst.msk [vmem:[%s4608_s3 + $0xc8] sm:$0xff] %vm2420_vm4, %v2381_v1 }
 0x2be   :  { %2447 = vst.msk [vmem:[%s4608_s3 + $0xd0] sm:$0xff] %vm2420_vm4, %v2382_v12  ;;  %v2243_v19 = vpop.xlane.xlu1 %2242 }
 0x2bf   :  { %v2383_v3 = vadd.f32 %v4283_v8, %v2243_v19  ;;  %v2246_v37 = vpop.xlane.xlu0 %2245 }
 0x2c0   :  { %v2384_v5 = vadd.f32 %v4283_v8, %v2246_v37 }
 0x2c1   :  { %2448 = vst.msk [vmem:[%s4608_s3 + $0xd8] sm:$0xff] %vm2420_vm4, %v2383_v3 }
 0x2c2   :  { %2449 = vst.msk [vmem:[%s4608_s3 + $0xe0] sm:$0xff] %vm2420_vm4, %v2384_v5  ;;  %v2249_v6 = vpop.xlane.xlu1 %2248 }
 0x2c3   :  { %v2385_v7 = vadd.f32 %v4283_v8, %v2249_v6  ;;  %v2252_v20 = vpop.xlane.xlu0 %2251 }
 0x2c4   :  { %v2386_v32 = vadd.f32 %v4283_v8, %v2252_v20 }
 0x2c5   :  { %2450 = vst.msk [vmem:[%s4608_s3 + $0xe8] sm:$0xff] %vm2420_vm4, %v2385_v7 }
 0x2c6   :  { %2451 = vst.msk [vmem:[%s4608_s3 + $0xf0] sm:$0xff] %vm2420_vm4, %v2386_v32  ;;  %v2255_v10 = vpop.xlane.xlu1 %2254 }
 0x2c7   :  { %v2387_v9 = vadd.f32 %v4283_v8, %v2255_v10 }
 0x2c9   :  { %2452 = vst.msk [vmem:[%s4608_s3 + $0xf8] sm:$0xff] %vm2420_vm4, %v2387_v9  ;;  %v2258_v33 = vpop.xlane.xlu0 %2257 }
 0x2ca   :  { %v2388_v31 = vadd.f32 %v4283_v8, %v2258_v33  ;;  %v2261_v21 = vpop.xlane.xlu1 %2260 }
 0x2cb   :  { %v2389_v11 = vadd.f32 %v4283_v8, %v2261_v21 }
 0x2cc   :  { %2453 = vst.msk [vmem:[%s4608_s3 + $0x100] sm:$0xff] %vm2420_vm4, %v2388_v31 }
 0x2cd   :  { %2454 = vst.msk [vmem:[%s4608_s3 + $0x108] sm:$0xff] %vm2420_vm4, %v2389_v11  ;;  %v2264_v13 = vpop.xlane.xlu0 %2263 }
 0x2ce   :  { %v2390_v14 = vadd.f32 %v4283_v8, %v2264_v13  ;;  %v2267_v34 = vpop.xlane.xlu1 %2266 }
 0x2cf   :  { %v2391_v15 = vadd.f32 %v4283_v8, %v2267_v34 }
 0x2d0   :  { %2455 = vst.msk [vmem:[%s4608_s3 + $0x110] sm:$0xff] %vm2420_vm4, %v2390_v14 }
 0x2d1   :  { %2456 = vst.msk [vmem:[%s4608_s3 + $0x118] sm:$0xff] %vm2420_vm4, %v2391_v15  ;;  %v2270_v22 = vpop.xlane.xlu0 %2269 }
 0x2d2   :  { %v2392_v35 = vadd.f32 %v4283_v8, %v2270_v22  ;;  %v2273_v39 = vpop.xlane.xlu1 %2272 }
 0x2d3   :  { %v2393_v40 = vadd.f32 %v4283_v8, %v2273_v39 }
 0x2d4   :  { %2457 = vst.msk [vmem:[%s4608_s3 + $0x120] sm:$0xff] %vm2420_vm4, %v2392_v35 }
 0x2d5   :  { %2458 = vst.msk [vmem:[%s4608_s3 + $0x128] sm:$0xff] %vm2420_vm4, %v2393_v40  ;;  %v2276_v23 = vpop.xlane.xlu0 %2275 }
 0x2d6   :  { %v2394_v41 = vadd.f32 %v4283_v8, %v2276_v23  ;;  %v2279_v36 = vpop.xlane.xlu1 %2278 }
 0x2d7   :  { %v2395_v43 = vadd.f32 %v4283_v8, %v2279_v36 }
 0x2d8   :  { %2459 = vst.msk [vmem:[%s4608_s3 + $0x130] sm:$0xff] %vm2420_vm4, %v2394_v41 }
 0x2d9   :  { %2460 = vst.msk [vmem:[%s4608_s3 + $0x138] sm:$0xff] %vm2420_vm4, %v2395_v43  ;;  %v2282_v45 = vpop.xlane.xlu0 %2281 }
 0x2da   :  { %v2396_v38 = vadd.f32 %v4283_v8, %v2282_v45  ;;  %v2285_v46 = vpop.xlane.xlu1 %2284 }
 0x2db   :  { %v2397_v24 = vadd.f32 %v4283_v8, %v2285_v46 }
 0x2dc   :  { %2461 = vst.msk [vmem:[%s4608_s3 + $0x140] sm:$0xff] %vm2420_vm4, %v2396_v38 }
 0x2dd   :  { %2462 = vst.msk [vmem:[%s4608_s3 + $0x148] sm:$0xff] %vm2420_vm4, %v2397_v24  ;;  %v2288_v47 = vpop.xlane.xlu0 %2287 }
 0x2de   :  { %v2398_v48 = vadd.f32 %v4283_v8, %v2288_v47  ;;  %v2291_v42 = vpop.xlane.xlu1 %2290 }
 0x2df   :  { %v2399_v25 = vadd.f32 %v4283_v8, %v2291_v42 }
 0x2e0   :  { %2463 = vst.msk [vmem:[%s4608_s3 + $0x150] sm:$0xff] %vm2420_vm4, %v2398_v48 }
 0x2e1   :  { %2464 = vst.msk [vmem:[%s4608_s3 + $0x158] sm:$0xff] %vm2420_vm4, %v2399_v25  ;;  %v2294_v49 = vpop.xlane.xlu0 %2293 }
 0x2e2   :  { %v2400_v44 = vadd.f32 %v4283_v8, %v2294_v49  ;;  %v2297_v51 = vpop.xlane.xlu1 %2296 }
 0x2e3   :  { %v2401_v53 = vadd.f32 %v4283_v8, %v2297_v51 }
 0x2e4   :  { %2465 = vst.msk [vmem:[%s4608_s3 + $0x160] sm:$0xff] %vm2420_vm4, %v2400_v44 }
 0x2e5   :  { %2466 = vst.msk [vmem:[%s4608_s3 + $0x168] sm:$0xff] %vm2420_vm4, %v2401_v53  ;;  %v2300_v54 = vpop.xlane.xlu0 %2299 }
 0x2e6   :  { %v2402_v26 = vadd.f32 %v4283_v8, %v2300_v54  ;;  %v2303_v50 = vpop.xlane.xlu1 %2302 }
 0x2e7   :  { %v2403_v55 = vadd.f32 %v4283_v8, %v2303_v50 }
 0x2e8   :  { %2467 = vst.msk [vmem:[%s4608_s3 + $0x170] sm:$0xff] %vm2420_vm4, %v2402_v26 }
 0x2e9   :  { %2468 = vst.msk [vmem:[%s4608_s3 + $0x178] sm:$0xff] %vm2420_vm4, %v2403_v55  ;;  %v2306_v56 = vpop.xlane.xlu0 %2305 }
 0x2ea   :  { %v2404_v52 = vadd.f32 %v4283_v8, %v2306_v56  ;;  %v2309_v27 = vpop.xlane.xlu1 %2308 }
 0x2eb   :  { %v2405_v57 = vadd.f32 %v4283_v8, %v2309_v27 }
 0x2ec   :  { %2469 = vst.msk [vmem:[%s4608_s3 + $0x180] sm:$0xff] %vm2420_vm4, %v2404_v52 }
 0x2ed   :  { %2470 = vst.msk [vmem:[%s4608_s3 + $0x188] sm:$0xff] %vm2420_vm4, %v2405_v57  ;;  %v2312_v16 = vpop.xlane.xlu0 %2311 }
 0x2ee   :  { %v2406_v17 = vadd.f32 %v4283_v8, %v2312_v16  ;;  %v2315_v58 = vpop.xlane.xlu1 %2314 }
 0x2ef   :  { %v2407_v59 = vadd.f32 %v4283_v8, %v2315_v58 }
 0x2f0   :  { %2471 = vst.msk [vmem:[%s4608_s3 + $0x190] sm:$0xff] %vm2420_vm4, %v2406_v17 }
 0x2f1   :  { %2472 = vst.msk [vmem:[%s4608_s3 + $0x198] sm:$0xff] %vm2420_vm4, %v2407_v59  ;;  %v2318_v28 = vpop.xlane.xlu0 %2317 }
 0x2f2   :  { %v2408_v60 = vadd.f32 %v4283_v8, %v2318_v28  ;;  %v2321_v61 = vpop.xlane.xlu1 %2320 }
 0x2f3   :  { %v2409_v62 = vadd.f32 %v4283_v8, %v2321_v61 }
 0x2f4   :  { %2473 = vst.msk [vmem:[%s4608_s3 + $0x1a0] sm:$0xff] %vm2420_vm4, %v2408_v60 }
 0x2f5   :  { %2474 = vst.msk [vmem:[%s4608_s3 + $0x1a8] sm:$0xff] %vm2420_vm4, %v2409_v62  ;;  %v2324_v29 = vpop.xlane.xlu0 %2323 }
 0x2f6   :  { %v2410_v63 = vadd.f32 %v4283_v8, %v2324_v29  ;;  %v2327_v2 = vpop.xlane.xlu1 %2326 }
 0x2f7   :  { %v2411_v0 = vadd.f32 %v4283_v8, %v2327_v2 }
 0x2f8   :  { %2475 = vst.msk [vmem:[%s4608_s3 + $0x1b0] sm:$0xff] %vm2420_vm4, %v2410_v63 }
 0x2f9   :  { %2476 = vst.msk [vmem:[%s4608_s3 + $0x1b8] sm:$0xff] %vm2420_vm4, %v2411_v0  ;;  %v2330_v18 = vpop.xlane.xlu0 %2329 }
 0x2fa   :  { %v2412_v4 = vadd.f32 %v4283_v8, %v2330_v18  ;;  %v2333_v1 = vpop.xlane.xlu1 %2332 }
 0x2fb   :  { %v2413_v30 = vadd.f32 %v4283_v8, %v2333_v1 }
 0x2fc   :  { %2477 = vst.msk [vmem:[%s4608_s3 + $0x1c0] sm:$0xff] %vm2420_vm4, %v2412_v4 }
 0x2fd   :  { %2478 = vst.msk [vmem:[%s4608_s3 + $0x1c8] sm:$0xff] %vm2420_vm4, %v2413_v30  ;;  %v2336_v12 = vpop.xlane.xlu0 %2335 }
 0x2fe   :  { %v2414_v19 = vadd.f32 %v4283_v8, %v2336_v12  ;;  %v2339_v3 = vpop.xlane.xlu1 %2338 }
 0x2ff   :  { %v2415_v37 = vadd.f32 %v4283_v8, %v2339_v3 }
 0x300   :  { %2479 = vst.msk [vmem:[%s4608_s3 + $0x1d0] sm:$0xff] %vm2420_vm4, %v2414_v19 }
 0x301   :  { %2480 = vst.msk [vmem:[%s4608_s3 + $0x1d8] sm:$0xff] %vm2420_vm4, %v2415_v37  ;;  %v2342_v5 = vpop.xlane.xlu0 %2341 }
 0x302   :  { %v2416_v6 = vadd.f32 %v4283_v8, %v2342_v5  ;;  %v2345_v7 = vpop.xlane.xlu1 %2344 }
 0x303   :  { %v2417_v20 = vadd.f32 %v4283_v8, %v2345_v7 }
 0x304   :  { %2481 = vst.msk [vmem:[%s4608_s3 + $0x1e0] sm:$0xff] %vm2420_vm4, %v2416_v6 }
 0x305   :  { %2482 = vst.msk [vmem:[%s4608_s3 + $0x1e8] sm:$0xff] %vm2420_vm4, %v2417_v20  ;;  %v2348_v32 = vpop.xlane.xlu0 %2347 }
 0x306   :  { %v2418_v10 = vadd.f32 %v4283_v8, %v2348_v32  ;;  %v2351_v9 = vpop.xlane.xlu1 %2350 }
 0x307   :  { %v2419_v33 = vadd.f32 %v4283_v8, %v2351_v9 }
 0x308   :  { %2483 = vst.msk [vmem:[%s4608_s3 + $0x1f0] sm:$0xff] %vm2420_vm4, %v2418_v10 }
 0x309   :  { %2484 = vst.msk [vmem:[%s4608_s3 + $0x1f8] sm:$0xff] %vm2420_vm4, %v2419_v33 }

</bundles_post_ra>
